<compile_context>
chip_gen: v5e
topology: v5e:2x2
jax: 0.10.0
libtpu: 0.0.40
codegen_flags: <defaults>
</compile_context>

<pallas_src>
import functools
import math

import jax
import jax.numpy as jnp
from jax.experimental import pallas as pl
from jax.experimental.pallas import tpu as pltpu


# ------------------------------ kernel helpers ------------------------------

def _layernorm(x, w, b, eps=1e-5):
    # PyTorch LayerNorm: biased variance, eps inside rsqrt. Keep f32.
    mu = jnp.mean(x, axis=-1, keepdims=True)
    var = jnp.mean((x - mu) * (x - mu), axis=-1, keepdims=True)
    return (x - mu) * jax.lax.rsqrt(var + eps) * w + b


def _encoder_kernel(num_layers, num_heads,
                    x_ref,
                    wqkv_ref, bqkv_ref, wo_ref, bo_ref,
                    ln1w_ref, ln1b_ref,
                    w1_ref, b1_ref, w2_ref, b2_ref,
                    ln2w_ref, ln2b_ref,
                    fw_ref, fb_ref,
                    out_ref,
                    ctx_scr):
    x = x_ref[...]                              # (B, S, E) f32
    B, S, E = x.shape
    H = num_heads
    dh = E // H
    x2 = x.reshape(B * S, E)                    # (BS, E) f32 — leading-dim merge only

    for l in range(num_layers):                 # static unroll: whole stack fused
        # ---------------- fused QKV projection: one (BS,E)@(E,3E) matmul ----------------
        xb = x2.astype(jnp.bfloat16)
        qkv = jnp.dot(xb, wqkv_ref[l],
                      preferred_element_type=jnp.float32) + bqkv_ref[l]   # (BS, 3E) f32
        # 1/sqrt(dh) is pre-folded into the Q columns/bias on the host.

        def split_heads(off):
            # (BS, 3E) lane-slices -> (H*B, S, dh); merged batch index g = h*B + b
            parts = [qkv[:, off + h * dh: off + (h + 1) * dh].reshape(B, S, dh)
                     for h in range(H)]
            return jnp.concatenate(parts, axis=0).astype(jnp.bfloat16)

        q = split_heads(0)
        k = split_heads(E)
        v = split_heads(2 * E)

        # ---------------- attention, batched over merged (H*B) dim ----------------
        s = jnp.einsum('gqd,gkd->gqk', q, k,
                       preferred_element_type=jnp.float32)                # (HB,S,S) f32
        s = s - jnp.max(s, axis=-1, keepdims=True)
        p = jnp.exp(s)
        p = p * pl.reciprocal(jnp.sum(p, axis=-1, keepdims=True), approx=True)
        ctx = jnp.einsum('gqk,gkd->gqd', p.astype(jnp.bfloat16), v,
                         preferred_element_type=jnp.float32)              # (HB,S,dh) f32

        # -------- merge heads into lane-contiguous (BS, E) via scratch stores --------
        for h in range(H):
            ctx_scr[:, h * dh:(h + 1) * dh] = ctx[h * B:(h + 1) * B].reshape(B * S, dh)

        # single K=E output projection instead of H small ones + cross-head reduce
        attn = jnp.dot(ctx_scr[...].astype(jnp.bfloat16), wo_ref[l],
                       preferred_element_type=jnp.float32) + bo_ref[l]    # (BS, E) f32

        # residual + post-norm 1
        x2 = _layernorm(x2 + attn, ln1w_ref[l], ln1b_ref[l])

        # ---------------- feed-forward: relu(x W1 + b1) W2 + b2 ----------------
        h1 = jnp.dot(x2.astype(jnp.bfloat16), w1_ref[l],
                     preferred_element_type=jnp.float32) + b1_ref[l]
        h1 = jnp.maximum(h1, 0.0)
        h2 = jnp.dot(h1.astype(jnp.bfloat16), w2_ref[l],
                     preferred_element_type=jnp.float32) + b2_ref[l]

        # residual + post-norm 2
        x2 = _layernorm(x2 + h2, ln2w_ref[l], ln2b_ref[l])

    # final encoder LayerNorm, fused into the same kernel
    out_ref[...] = _layernorm(x2, fw_ref[...], fb_ref[...]).reshape(B, S, E)


# ------------------------------ host wrappers --------------------------------

_PARAM_ORDER = ("wqkv", "bqkv", "wo", "bo", "ln1w", "ln1b",
                "w1", "b1", "w2", "b2", "ln2w", "ln2b", "fw", "fb")


def transformer_encoder(x, packed, num_heads):
    B, S, E = x.shape
    num_layers = packed["wqkv"].shape[0]
    args = [packed[k] for k in _PARAM_ORDER]
    kernel = functools.partial(_encoder_kernel, num_layers, num_heads)
    # No grid: the whole batch is one kernel invocation; all inputs/weights are
    # placed fully in VMEM (no double-buffering needed since there is no pipeline).
    return pl.pallas_call(
        kernel,
        out_shape=jax.ShapeDtypeStruct((B, S, E), jnp.float32),
        scratch_shapes=[pltpu.VMEM((B * S, E), jnp.float32)],   # head-merge buffer
    )(x, *args)


# --------------------------- parameter construction --------------------------

def make_torch_style_params(key, embed_dim, num_heads, dense_dim, num_layers):
    """Random parameters in PyTorch layout (Linear weight = (out, in))."""
    layers = []
    for _ in range(num_layers):
        keys = jax.random.split(key, 7)
        key = keys[0]
        layers.append(dict(
            in_proj_weight=0.05 * jax.random.normal(
                keys[1], (3 * embed_dim, embed_dim), jnp.float32),
            in_proj_bias=0.01 * jax.random.normal(
                keys[2], (3 * embed_dim,), jnp.float32),
            out_proj_weight=0.05 * jax.random.normal(
                keys[3], (embed_dim, embed_dim), jnp.float32),
            out_proj_bias=0.01 * jax.random.normal(
                keys[4], (embed_dim,), jnp.float32),
            ln1_weight=jnp.ones((embed_dim,), jnp.float32),
            ln1_bias=jnp.zeros((embed_dim,), jnp.float32),
            linear1_weight=0.05 * jax.random.normal(
                keys[5], (dense_dim, embed_dim), jnp.float32),
            linear1_bias=jnp.zeros((dense_dim,), jnp.float32),
            linear2_weight=0.05 * jax.random.normal(
                keys[6], (embed_dim, dense_dim), jnp.float32),
            linear2_bias=jnp.zeros((embed_dim,), jnp.float32),
            ln2_weight=jnp.ones((embed_dim,), jnp.float32),
            ln2_bias=jnp.zeros((embed_dim,), jnp.float32),
        ))
    final_w = jnp.ones((embed_dim,), jnp.float32)
    final_b = jnp.zeros((embed_dim,), jnp.float32)
    return layers, final_w, final_b


def pack_params(layers, final_w, final_b, num_heads):
    """Pre-transpose weights on the host, fold the Q scale, stack over layers."""
    E = final_w.shape[0]
    H = num_heads
    dh = E // H
    F = layers[0]["linear1_weight"].shape[0]
    scale = 1.0 / math.sqrt(dh)
    # Fold 1/sqrt(dh) into the Q third of the fused QKV projection (weights + bias).
    qscale = jnp.concatenate(
        [jnp.full((E,), scale, jnp.float32), jnp.ones((2 * E,), jnp.float32)])

    def per_layer(p):
        wqkv = p["in_proj_weight"].T * qscale[None, :]          # (E, 3E), y = x @ W.T
        bqkv = (p["in_proj_bias"] * qscale).reshape(1, 3 * E)
        return dict(
            wqkv=wqkv.astype(jnp.bfloat16),
            bqkv=bqkv,
            wo=p["out_proj_weight"].T.astype(jnp.bfloat16),     # (E, E)
            bo=p["out_proj_bias"].reshape(1, E),
            ln1w=p["ln1_weight"].reshape(1, E),
            ln1b=p["ln1_bias"].reshape(1, E),
            w1=p["linear1_weight"].T.astype(jnp.bfloat16),      # (E, F)
            b1=p["linear1_bias"].reshape(1, F),
            w2=p["linear2_weight"].T.astype(jnp.bfloat16),      # (F, E)
            b2=p["linear2_bias"].reshape(1, E),
            ln2w=p["ln2_weight"].reshape(1, E),
            ln2b=p["ln2_bias"].reshape(1, E),
        )

    per = [per_layer(p) for p in layers]
    packed = {k: jnp.stack([pp[k] for pp in per], axis=0) for k in per[0]}
    packed["fw"] = final_w.reshape(1, E)
    packed["fb"] = final_b.reshape(1, E)
    return packed


# ------------------------------------ main ------------------------------------

if __name__ == "__main__":
    embed_dim, num_heads, dense_dim, num_layers = 32, 4, 64, 2
    batch, seq = 2, 8

    key = jax.random.PRNGKey(0)
    kx, kp = jax.random.split(key)
    x = jax.random.normal(kx, (batch, seq, embed_dim), jnp.float32)

    layers, final_w, final_b = make_torch_style_params(
        kp, embed_dim, num_heads, dense_dim, num_layers)
    packed = pack_params(layers, final_w, final_b, num_heads)

    out = transformer_encoder(x, packed, num_heads)
    out = jax.block_until_ready(out)

    assert out.shape == (batch, seq, embed_dim)
    assert bool(jnp.all(jnp.isfinite(out)))
    print("KERNEL_OK")
</pallas_src>

<mosaic_0001>
module attributes {stable_mosaic.version = 11 : i64} {
  func.func @_encoder_kernel(%arg0: memref<2x8x32xf32, #tpu.memory_space<vmem>>, %arg1: memref<2x32x96xbf16, #tpu.memory_space<vmem>>, %arg2: memref<2x1x96xf32, #tpu.memory_space<vmem>>, %arg3: memref<2x32x32xbf16, #tpu.memory_space<vmem>>, %arg4: memref<2x1x32xf32, #tpu.memory_space<vmem>>, %arg5: memref<2x1x32xf32, #tpu.memory_space<vmem>>, %arg6: memref<2x1x32xf32, #tpu.memory_space<vmem>>, %arg7: memref<2x32x64xbf16, #tpu.memory_space<vmem>>, %arg8: memref<2x1x64xf32, #tpu.memory_space<vmem>>, %arg9: memref<2x64x32xbf16, #tpu.memory_space<vmem>>, %arg10: memref<2x1x32xf32, #tpu.memory_space<vmem>>, %arg11: memref<2x1x32xf32, #tpu.memory_space<vmem>>, %arg12: memref<2x1x32xf32, #tpu.memory_space<vmem>>, %arg13: memref<1x32xf32, #tpu.memory_space<vmem>>, %arg14: memref<1x32xf32, #tpu.memory_space<vmem>>, %arg15: memref<2x8x32xf32, #tpu.memory_space<vmem>>, %arg16: memref<16x32xf32, #tpu.memory_space<vmem>>) attributes {dimension_semantics = [], scalar_prefetch = 0 : i64, scratch_operands = 1 : i64, tpu.core_type = #tpu.core_type<tc>} {
    %c0 = arith.constant 0 : index
    %c0_0 = arith.constant 0 : index
    %c0_1 = arith.constant 0 : index
    %0 = vector.load %arg0[%c0, %c0_0, %c0_1] : memref<2x8x32xf32, #tpu.memory_space<vmem>>, vector<2x8x32xf32>
    %1 = vector.shape_cast %0 : vector<2x8x32xf32> to vector<16x32xf32>
    %2 = arith.truncf %1 : vector<16x32xf32> to vector<16x32xbf16>
    %c0_2 = arith.constant 0 : index
    %c0_3 = arith.constant 0 : index
    %c0_4 = arith.constant 0 : index
    %3 = vector.load %arg1[%c0_2, %c0_3, %c0_4] : memref<2x32x96xbf16, #tpu.memory_space<vmem>>, vector<1x32x96xbf16>
    %4 = vector.shape_cast %3 : vector<1x32x96xbf16> to vector<32x96xbf16>
    %cst = arith.constant dense<0.000000e+00> : vector<16x96xf32>
    %5 = tpu.matmul %2, %4, %cst {dimension_numbers = #tpu.dot_dimension_numbers<[1], [0], [0], [1], [0, 0, 1, 1], [], []>} : vector<16x32xbf16>, vector<32x96xbf16>, vector<16x96xf32> -> vector<16x96xf32>
    %c0_5 = arith.constant 0 : index
    %c0_6 = arith.constant 0 : index
    %c0_7 = arith.constant 0 : index
    %6 = vector.load %arg2[%c0_5, %c0_6, %c0_7] : memref<2x1x96xf32, #tpu.memory_space<vmem>>, vector<1x1x96xf32>
    %7 = vector.shape_cast %6 : vector<1x1x96xf32> to vector<1x96xf32>
    %8 = vector.broadcast %7 : vector<1x96xf32> to vector<16x96xf32>
    %9 = arith.addf %5, %8 : vector<16x96xf32>
    %10 = vector.extract_strided_slice %9 {offsets = [0, 0], sizes = [16, 8], strides = [1, 1]} : vector<16x96xf32> to vector<16x8xf32>
    %11 = vector.shape_cast %10 : vector<16x8xf32> to vector<2x8x8xf32>
    %12 = vector.extract_strided_slice %9 {offsets = [0, 8], sizes = [16, 8], strides = [1, 1]} : vector<16x96xf32> to vector<16x8xf32>
    %13 = vector.shape_cast %12 : vector<16x8xf32> to vector<2x8x8xf32>
    %14 = vector.extract_strided_slice %9 {offsets = [0, 16], sizes = [16, 8], strides = [1, 1]} : vector<16x96xf32> to vector<16x8xf32>
    %15 = vector.shape_cast %14 : vector<16x8xf32> to vector<2x8x8xf32>
    %16 = vector.extract_strided_slice %9 {offsets = [0, 24], sizes = [16, 8], strides = [1, 1]} : vector<16x96xf32> to vector<16x8xf32>
    %17 = vector.shape_cast %16 : vector<16x8xf32> to vector<2x8x8xf32>
    %18 = tpu.concatenate %11, %13, %15, %17 in 0 : vector<2x8x8xf32>, vector<2x8x8xf32>, vector<2x8x8xf32>, vector<2x8x8xf32> -> vector<8x8x8xf32>
    %19 = arith.truncf %18 : vector<8x8x8xf32> to vector<8x8x8xbf16>
    %20 = vector.extract_strided_slice %9 {offsets = [0, 32], sizes = [16, 8], strides = [1, 1]} : vector<16x96xf32> to vector<16x8xf32>
    %21 = vector.shape_cast %20 : vector<16x8xf32> to vector<2x8x8xf32>
    %22 = vector.extract_strided_slice %9 {offsets = [0, 40], sizes = [16, 8], strides = [1, 1]} : vector<16x96xf32> to vector<16x8xf32>
    %23 = vector.shape_cast %22 : vector<16x8xf32> to vector<2x8x8xf32>
    %24 = vector.extract_strided_slice %9 {offsets = [0, 48], sizes = [16, 8], strides = [1, 1]} : vector<16x96xf32> to vector<16x8xf32>
    %25 = vector.shape_cast %24 : vector<16x8xf32> to vector<2x8x8xf32>
    %26 = vector.extract_strided_slice %9 {offsets = [0, 56], sizes = [16, 8], strides = [1, 1]} : vector<16x96xf32> to vector<16x8xf32>
    %27 = vector.shape_cast %26 : vector<16x8xf32> to vector<2x8x8xf32>
    %28 = tpu.concatenate %21, %23, %25, %27 in 0 : vector<2x8x8xf32>, vector<2x8x8xf32>, vector<2x8x8xf32>, vector<2x8x8xf32> -> vector<8x8x8xf32>
    %29 = arith.truncf %28 : vector<8x8x8xf32> to vector<8x8x8xbf16>
    %30 = vector.extract_strided_slice %9 {offsets = [0, 64], sizes = [16, 8], strides = [1, 1]} : vector<16x96xf32> to vector<16x8xf32>
    %31 = vector.shape_cast %30 : vector<16x8xf32> to vector<2x8x8xf32>
    %32 = vector.extract_strided_slice %9 {offsets = [0, 72], sizes = [16, 8], strides = [1, 1]} : vector<16x96xf32> to vector<16x8xf32>
    %33 = vector.shape_cast %32 : vector<16x8xf32> to vector<2x8x8xf32>
    %34 = vector.extract_strided_slice %9 {offsets = [0, 80], sizes = [16, 8], strides = [1, 1]} : vector<16x96xf32> to vector<16x8xf32>
    %35 = vector.shape_cast %34 : vector<16x8xf32> to vector<2x8x8xf32>
    %36 = vector.extract_strided_slice %9 {offsets = [0, 88], sizes = [16, 8], strides = [1, 1]} : vector<16x96xf32> to vector<16x8xf32>
    %37 = vector.shape_cast %36 : vector<16x8xf32> to vector<2x8x8xf32>
    %38 = tpu.concatenate %31, %33, %35, %37 in 0 : vector<2x8x8xf32>, vector<2x8x8xf32>, vector<2x8x8xf32>, vector<2x8x8xf32> -> vector<8x8x8xf32>
    %39 = arith.truncf %38 : vector<8x8x8xf32> to vector<8x8x8xbf16>
    "tpu.trace_start"() <{level = 10 : i32, message = "gqd,gkd->gqk"}> : () -> ()
    %cst_8 = arith.constant dense<0.000000e+00> : vector<8x8x8xf32>
    %40 = tpu.matmul %19, %29, %cst_8 {dimension_numbers = #tpu.dot_dimension_numbers<[2], [2], [1], [1], [0, 0, 0, 1, 1, 1], [0], [0]>} : vector<8x8x8xbf16>, vector<8x8x8xbf16>, vector<8x8x8xf32> -> vector<8x8x8xf32>
    "tpu.trace_stop"() : () -> ()
    %cst_9 = arith.constant dense<0xFF800000> : vector<8x8xf32>
    %41 = vector.multi_reduction <maximumf>, %40, %cst_9 [2] : vector<8x8x8xf32> to vector<8x8xf32>
    %42 = vector.shape_cast %41 : vector<8x8xf32> to vector<8x8x1xf32>
    %43 = vector.broadcast %42 : vector<8x8x1xf32> to vector<8x8x8xf32>
    %44 = arith.subf %40, %43 : vector<8x8x8xf32>
    %45 = math.exp %44 : vector<8x8x8xf32>
    %cst_10 = arith.constant dense<0.000000e+00> : vector<8x8xf32>
    %46 = vector.multi_reduction <add>, %45, %cst_10 [2] : vector<8x8x8xf32> to vector<8x8xf32>
    %47 = vector.shape_cast %46 : vector<8x8xf32> to vector<8x8x1xf32>
    %48 = tpu.reciprocal %47 {approx = true} : vector<8x8x1xf32> -> vector<8x8x1xf32>
    %49 = vector.broadcast %48 : vector<8x8x1xf32> to vector<8x8x8xf32>
    %50 = arith.mulf %45, %49 : vector<8x8x8xf32>
    %51 = arith.truncf %50 : vector<8x8x8xf32> to vector<8x8x8xbf16>
    "tpu.trace_start"() <{level = 10 : i32, message = "gqk,gkd->gqd"}> : () -> ()
    %cst_11 = arith.constant dense<0.000000e+00> : vector<8x8x8xf32>
    %52 = tpu.matmul %51, %39, %cst_11 {dimension_numbers = #tpu.dot_dimension_numbers<[2], [1], [1], [2], [0, 0, 0, 1, 1, 2], [0], [0]>} : vector<8x8x8xbf16>, vector<8x8x8xbf16>, vector<8x8x8xf32> -> vector<8x8x8xf32>
    "tpu.trace_stop"() : () -> ()
    %53 = vector.extract_strided_slice %52 {offsets = [0, 0, 0], sizes = [2, 8, 8], strides = [1, 1, 1]} : vector<8x8x8xf32> to vector<2x8x8xf32>
    %54 = vector.shape_cast %53 : vector<2x8x8xf32> to vector<16x8xf32>
    %c0_12 = arith.constant 0 : index
    %c0_13 = arith.constant 0 : index
    %55 = vector.load %arg16[%c0_12, %c0_13] : memref<16x32xf32, #tpu.memory_space<vmem>>, vector<16x8xf32>
    tpu.vector_store %arg16[%c0_12, %c0_13], %54 {strides = array<i32>} : memref<16x32xf32, #tpu.memory_space<vmem>>, vector<16x8xf32>,
    %56 = vector.extract_strided_slice %52 {offsets = [2, 0, 0], sizes = [2, 8, 8], strides = [1, 1, 1]} : vector<8x8x8xf32> to vector<2x8x8xf32>
    %57 = vector.shape_cast %56 : vector<2x8x8xf32> to vector<16x8xf32>
    %c0_14 = arith.constant 0 : index
    %c8 = arith.constant 8 : index
    %58 = vector.load %arg16[%c0_14, %c8] : memref<16x32xf32, #tpu.memory_space<vmem>>, vector<16x8xf32>
    tpu.vector_store %arg16[%c0_14, %c8], %57 {strides = array<i32>} : memref<16x32xf32, #tpu.memory_space<vmem>>, vector<16x8xf32>,
    %59 = vector.extract_strided_slice %52 {offsets = [4, 0, 0], sizes = [2, 8, 8], strides = [1, 1, 1]} : vector<8x8x8xf32> to vector<2x8x8xf32>
    %60 = vector.shape_cast %59 : vector<2x8x8xf32> to vector<16x8xf32>
    %c0_15 = arith.constant 0 : index
    %c16 = arith.constant 16 : index
    %61 = vector.load %arg16[%c0_15, %c16] : memref<16x32xf32, #tpu.memory_space<vmem>>, vector<16x8xf32>
    tpu.vector_store %arg16[%c0_15, %c16], %60 {strides = array<i32>} : memref<16x32xf32, #tpu.memory_space<vmem>>, vector<16x8xf32>,
    %62 = vector.extract_strided_slice %52 {offsets = [6, 0, 0], sizes = [2, 8, 8], strides = [1, 1, 1]} : vector<8x8x8xf32> to vector<2x8x8xf32>
    %63 = vector.shape_cast %62 : vector<2x8x8xf32> to vector<16x8xf32>
    %c0_16 = arith.constant 0 : index
    %c24 = arith.constant 24 : index
    %64 = vector.load %arg16[%c0_16, %c24] : memref<16x32xf32, #tpu.memory_space<vmem>>, vector<16x8xf32>
    tpu.vector_store %arg16[%c0_16, %c24], %63 {strides = array<i32>} : memref<16x32xf32, #tpu.memory_space<vmem>>, vector<16x8xf32>,
    %c0_17 = arith.constant 0 : index
    %c0_18 = arith.constant 0 : index
    %65 = vector.load %arg16[%c0_17, %c0_18] : memref<16x32xf32, #tpu.memory_space<vmem>>, vector<16x32xf32>
    %66 = arith.truncf %65 : vector<16x32xf32> to vector<16x32xbf16>
    %c0_19 = arith.constant 0 : index
    %c0_20 = arith.constant 0 : index
    %c0_21 = arith.constant 0 : index
    %67 = vector.load %arg3[%c0_19, %c0_20, %c0_21] : memref<2x32x32xbf16, #tpu.memory_space<vmem>>, vector<1x32x32xbf16>
    %68 = vector.shape_cast %67 : vector<1x32x32xbf16> to vector<32x32xbf16>
    %cst_22 = arith.constant dense<0.000000e+00> : vector<16x32xf32>
    %69 = tpu.matmul %66, %68, %cst_22 {dimension_numbers = #tpu.dot_dimension_numbers<[1], [0], [0], [1], [0, 0, 1, 1], [], []>} : vector<16x32xbf16>, vector<32x32xbf16>, vector<16x32xf32> -> vector<16x32xf32>
    %c0_23 = arith.constant 0 : index
    %c0_24 = arith.constant 0 : index
    %c0_25 = arith.constant 0 : index
    %70 = vector.load %arg4[%c0_23, %c0_24, %c0_25] : memref<2x1x32xf32, #tpu.memory_space<vmem>>, vector<1x1x32xf32>
    %71 = vector.shape_cast %70 : vector<1x1x32xf32> to vector<1x32xf32>
    %72 = vector.broadcast %71 : vector<1x32xf32> to vector<16x32xf32>
    %73 = arith.addf %69, %72 : vector<16x32xf32>
    %74 = arith.addf %1, %73 : vector<16x32xf32>
    %c0_26 = arith.constant 0 : index
    %c0_27 = arith.constant 0 : index
    %c0_28 = arith.constant 0 : index
    %75 = vector.load %arg5[%c0_26, %c0_27, %c0_28] : memref<2x1x32xf32, #tpu.memory_space<vmem>>, vector<1x1x32xf32>
    %76 = vector.shape_cast %75 : vector<1x1x32xf32> to vector<1x32xf32>
    %c0_29 = arith.constant 0 : index
    %c0_30 = arith.constant 0 : index
    %c0_31 = arith.constant 0 : index
    %77 = vector.load %arg6[%c0_29, %c0_30, %c0_31] : memref<2x1x32xf32, #tpu.memory_space<vmem>>, vector<1x1x32xf32>
    %78 = vector.shape_cast %77 : vector<1x1x32xf32> to vector<1x32xf32>
    %cst_32 = arith.constant dense<0.000000e+00> : vector<16xf32>
    %79 = vector.multi_reduction <add>, %74, %cst_32 [1] : vector<16x32xf32> to vector<16xf32>
    %80 = vector.shape_cast %79 : vector<16xf32> to vector<16x1xf32>
    %cst_33 = arith.constant 3.200000e+01 : f32
    %81 = vector.broadcast %cst_33 : f32 to vector<16x1xf32>
    %82 = arith.divf %80, %81 : vector<16x1xf32>
    %83 = vector.broadcast %82 : vector<16x1xf32> to vector<16x32xf32>
    %84 = arith.subf %74, %83 : vector<16x32xf32>
    %85 = vector.broadcast %82 : vector<16x1xf32> to vector<16x32xf32>
    %86 = arith.subf %74, %85 : vector<16x32xf32>
    %87 = arith.mulf %84, %86 : vector<16x32xf32>
    %cst_34 = arith.constant dense<0.000000e+00> : vector<16xf32>
    %88 = vector.multi_reduction <add>, %87, %cst_34 [1] : vector<16x32xf32> to vector<16xf32>
    %89 = vector.shape_cast %88 : vector<16xf32> to vector<16x1xf32>
    %cst_35 = arith.constant 3.200000e+01 : f32
    %90 = vector.broadcast %cst_35 : f32 to vector<16x1xf32>
    %91 = arith.divf %89, %90 : vector<16x1xf32>
    %92 = vector.broadcast %82 : vector<16x1xf32> to vector<16x32xf32>
    %93 = arith.subf %74, %92 : vector<16x32xf32>
    %cst_36 = arith.constant 9.99999974E-6 : f32
    %94 = vector.broadcast %cst_36 : f32 to vector<16x1xf32>
    %95 = arith.addf %91, %94 : vector<16x1xf32>
    %96 = math.rsqrt %95 : vector<16x1xf32>
    %97 = vector.broadcast %96 : vector<16x1xf32> to vector<16x32xf32>
    %98 = arith.mulf %93, %97 : vector<16x32xf32>
    %99 = vector.broadcast %76 : vector<1x32xf32> to vector<16x32xf32>
    %100 = arith.mulf %98, %99 : vector<16x32xf32>
    %101 = vector.broadcast %78 : vector<1x32xf32> to vector<16x32xf32>
    %102 = arith.addf %100, %101 : vector<16x32xf32>
    %103 = arith.truncf %102 : vector<16x32xf32> to vector<16x32xbf16>
    %c0_37 = arith.constant 0 : index
    %c0_38 = arith.constant 0 : index
    %c0_39 = arith.constant 0 : index
    %104 = vector.load %arg7[%c0_37, %c0_38, %c0_39] : memref<2x32x64xbf16, #tpu.memory_space<vmem>>, vector<1x32x64xbf16>
    %105 = vector.shape_cast %104 : vector<1x32x64xbf16> to vector<32x64xbf16>
    %cst_40 = arith.constant dense<0.000000e+00> : vector<16x64xf32>
    %106 = tpu.matmul %103, %105, %cst_40 {dimension_numbers = #tpu.dot_dimension_numbers<[1], [0], [0], [1], [0, 0, 1, 1], [], []>} : vector<16x32xbf16>, vector<32x64xbf16>, vector<16x64xf32> -> vector<16x64xf32>
    %c0_41 = arith.constant 0 : index
    %c0_42 = arith.constant 0 : index
    %c0_43 = arith.constant 0 : index
    %107 = vector.load %arg8[%c0_41, %c0_42, %c0_43] : memref<2x1x64xf32, #tpu.memory_space<vmem>>, vector<1x1x64xf32>
    %108 = vector.shape_cast %107 : vector<1x1x64xf32> to vector<1x64xf32>
    %109 = vector.broadcast %108 : vector<1x64xf32> to vector<16x64xf32>
    %110 = arith.addf %106, %109 : vector<16x64xf32>
    %cst_44 = arith.constant 0.000000e+00 : f32
    %111 = vector.broadcast %cst_44 : f32 to vector<16x64xf32>
    %112 = arith.maximumf %110, %111 : vector<16x64xf32>
    %113 = arith.truncf %112 : vector<16x64xf32> to vector<16x64xbf16>
    %c0_45 = arith.constant 0 : index
    %c0_46 = arith.constant 0 : index
    %c0_47 = arith.constant 0 : index
    %114 = vector.load %arg9[%c0_45, %c0_46, %c0_47] : memref<2x64x32xbf16, #tpu.memory_space<vmem>>, vector<1x64x32xbf16>
    %115 = vector.shape_cast %114 : vector<1x64x32xbf16> to vector<64x32xbf16>
    %cst_48 = arith.constant dense<0.000000e+00> : vector<16x32xf32>
    %116 = tpu.matmul %113, %115, %cst_48 {dimension_numbers = #tpu.dot_dimension_numbers<[1], [0], [0], [1], [0, 0, 1, 1], [], []>} : vector<16x64xbf16>, vector<64x32xbf16>, vector<16x32xf32> -> vector<16x32xf32>
    %c0_49 = arith.constant 0 : index
    %c0_50 = arith.constant 0 : index
    %c0_51 = arith.constant 0 : index
    %117 = vector.load %arg10[%c0_49, %c0_50, %c0_51] : memref<2x1x32xf32, #tpu.memory_space<vmem>>, vector<1x1x32xf32>
    %118 = vector.shape_cast %117 : vector<1x1x32xf32> to vector<1x32xf32>
    %119 = vector.broadcast %118 : vector<1x32xf32> to vector<16x32xf32>
    %120 = arith.addf %116, %119 : vector<16x32xf32>
    %121 = arith.addf %102, %120 : vector<16x32xf32>
    %c0_52 = arith.constant 0 : index
    %c0_53 = arith.constant 0 : index
    %c0_54 = arith.constant 0 : index
    %122 = vector.load %arg11[%c0_52, %c0_53, %c0_54] : memref<2x1x32xf32, #tpu.memory_space<vmem>>, vector<1x1x32xf32>
    %123 = vector.shape_cast %122 : vector<1x1x32xf32> to vector<1x32xf32>
    %c0_55 = arith.constant 0 : index
    %c0_56 = arith.constant 0 : index
    %c0_57 = arith.constant 0 : index
    %124 = vector.load %arg12[%c0_55, %c0_56, %c0_57] : memref<2x1x32xf32, #tpu.memory_space<vmem>>, vector<1x1x32xf32>
    %125 = vector.shape_cast %124 : vector<1x1x32xf32> to vector<1x32xf32>
    %cst_58 = arith.constant dense<0.000000e+00> : vector<16xf32>
    %126 = vector.multi_reduction <add>, %121, %cst_58 [1] : vector<16x32xf32> to vector<16xf32>
    %127 = vector.shape_cast %126 : vector<16xf32> to vector<16x1xf32>
    %cst_59 = arith.constant 3.200000e+01 : f32
    %128 = vector.broadcast %cst_59 : f32 to vector<16x1xf32>
    %129 = arith.divf %127, %128 : vector<16x1xf32>
    %130 = vector.broadcast %129 : vector<16x1xf32> to vector<16x32xf32>
    %131 = arith.subf %121, %130 : vector<16x32xf32>
    %132 = vector.broadcast %129 : vector<16x1xf32> to vector<16x32xf32>
    %133 = arith.subf %121, %132 : vector<16x32xf32>
    %134 = arith.mulf %131, %133 : vector<16x32xf32>
    %cst_60 = arith.constant dense<0.000000e+00> : vector<16xf32>
    %135 = vector.multi_reduction <add>, %134, %cst_60 [1] : vector<16x32xf32> to vector<16xf32>
    %136 = vector.shape_cast %135 : vector<16xf32> to vector<16x1xf32>
    %cst_61 = arith.constant 3.200000e+01 : f32
    %137 = vector.broadcast %cst_61 : f32 to vector<16x1xf32>
    %138 = arith.divf %136, %137 : vector<16x1xf32>
    %139 = vector.broadcast %129 : vector<16x1xf32> to vector<16x32xf32>
    %140 = arith.subf %121, %139 : vector<16x32xf32>
    %cst_62 = arith.constant 9.99999974E-6 : f32
    %141 = vector.broadcast %cst_62 : f32 to vector<16x1xf32>
    %142 = arith.addf %138, %141 : vector<16x1xf32>
    %143 = math.rsqrt %142 : vector<16x1xf32>
    %144 = vector.broadcast %143 : vector<16x1xf32> to vector<16x32xf32>
    %145 = arith.mulf %140, %144 : vector<16x32xf32>
    %146 = vector.broadcast %123 : vector<1x32xf32> to vector<16x32xf32>
    %147 = arith.mulf %145, %146 : vector<16x32xf32>
    %148 = vector.broadcast %125 : vector<1x32xf32> to vector<16x32xf32>
    %149 = arith.addf %147, %148 : vector<16x32xf32>
    %150 = arith.truncf %149 : vector<16x32xf32> to vector<16x32xbf16>
    %c1 = arith.constant 1 : index
    %c0_63 = arith.constant 0 : index
    %c0_64 = arith.constant 0 : index
    %151 = vector.load %arg1[%c1, %c0_63, %c0_64] : memref<2x32x96xbf16, #tpu.memory_space<vmem>>, vector<1x32x96xbf16>
    %152 = vector.shape_cast %151 : vector<1x32x96xbf16> to vector<32x96xbf16>
    %cst_65 = arith.constant dense<0.000000e+00> : vector<16x96xf32>
    %153 = tpu.matmul %150, %152, %cst_65 {dimension_numbers = #tpu.dot_dimension_numbers<[1], [0], [0], [1], [0, 0, 1, 1], [], []>} : vector<16x32xbf16>, vector<32x96xbf16>, vector<16x96xf32> -> vector<16x96xf32>
    %c1_66 = arith.constant 1 : index
    %c0_67 = arith.constant 0 : index
    %c0_68 = arith.constant 0 : index
    %154 = vector.load %arg2[%c1_66, %c0_67, %c0_68] : memref<2x1x96xf32, #tpu.memory_space<vmem>>, vector<1x1x96xf32>
    %155 = vector.shape_cast %154 : vector<1x1x96xf32> to vector<1x96xf32>
    %156 = vector.broadcast %155 : vector<1x96xf32> to vector<16x96xf32>
    %157 = arith.addf %153, %156 : vector<16x96xf32>
    %158 = vector.extract_strided_slice %157 {offsets = [0, 0], sizes = [16, 8], strides = [1, 1]} : vector<16x96xf32> to vector<16x8xf32>
    %159 = vector.shape_cast %158 : vector<16x8xf32> to vector<2x8x8xf32>
    %160 = vector.extract_strided_slice %157 {offsets = [0, 8], sizes = [16, 8], strides = [1, 1]} : vector<16x96xf32> to vector<16x8xf32>
    %161 = vector.shape_cast %160 : vector<16x8xf32> to vector<2x8x8xf32>
    %162 = vector.extract_strided_slice %157 {offsets = [0, 16], sizes = [16, 8], strides = [1, 1]} : vector<16x96xf32> to vector<16x8xf32>
    %163 = vector.shape_cast %162 : vector<16x8xf32> to vector<2x8x8xf32>
    %164 = vector.extract_strided_slice %157 {offsets = [0, 24], sizes = [16, 8], strides = [1, 1]} : vector<16x96xf32> to vector<16x8xf32>
    %165 = vector.shape_cast %164 : vector<16x8xf32> to vector<2x8x8xf32>
    %166 = tpu.concatenate %159, %161, %163, %165 in 0 : vector<2x8x8xf32>, vector<2x8x8xf32>, vector<2x8x8xf32>, vector<2x8x8xf32> -> vector<8x8x8xf32>
    %167 = arith.truncf %166 : vector<8x8x8xf32> to vector<8x8x8xbf16>
    %168 = vector.extract_strided_slice %157 {offsets = [0, 32], sizes = [16, 8], strides = [1, 1]} : vector<16x96xf32> to vector<16x8xf32>
    %169 = vector.shape_cast %168 : vector<16x8xf32> to vector<2x8x8xf32>
    %170 = vector.extract_strided_slice %157 {offsets = [0, 40], sizes = [16, 8], strides = [1, 1]} : vector<16x96xf32> to vector<16x8xf32>
    %171 = vector.shape_cast %170 : vector<16x8xf32> to vector<2x8x8xf32>
    %172 = vector.extract_strided_slice %157 {offsets = [0, 48], sizes = [16, 8], strides = [1, 1]} : vector<16x96xf32> to vector<16x8xf32>
    %173 = vector.shape_cast %172 : vector<16x8xf32> to vector<2x8x8xf32>
    %174 = vector.extract_strided_slice %157 {offsets = [0, 56], sizes = [16, 8], strides = [1, 1]} : vector<16x96xf32> to vector<16x8xf32>
    %175 = vector.shape_cast %174 : vector<16x8xf32> to vector<2x8x8xf32>
    %176 = tpu.concatenate %169, %171, %173, %175 in 0 : vector<2x8x8xf32>, vector<2x8x8xf32>, vector<2x8x8xf32>, vector<2x8x8xf32> -> vector<8x8x8xf32>
    %177 = arith.truncf %176 : vector<8x8x8xf32> to vector<8x8x8xbf16>
    %178 = vector.extract_strided_slice %157 {offsets = [0, 64], sizes = [16, 8], strides = [1, 1]} : vector<16x96xf32> to vector<16x8xf32>
    %179 = vector.shape_cast %178 : vector<16x8xf32> to vector<2x8x8xf32>
    %180 = vector.extract_strided_slice %157 {offsets = [0, 72], sizes = [16, 8], strides = [1, 1]} : vector<16x96xf32> to vector<16x8xf32>
    %181 = vector.shape_cast %180 : vector<16x8xf32> to vector<2x8x8xf32>
    %182 = vector.extract_strided_slice %157 {offsets = [0, 80], sizes = [16, 8], strides = [1, 1]} : vector<16x96xf32> to vector<16x8xf32>
    %183 = vector.shape_cast %182 : vector<16x8xf32> to vector<2x8x8xf32>
    %184 = vector.extract_strided_slice %157 {offsets = [0, 88], sizes = [16, 8], strides = [1, 1]} : vector<16x96xf32> to vector<16x8xf32>
    %185 = vector.shape_cast %184 : vector<16x8xf32> to vector<2x8x8xf32>
    %186 = tpu.concatenate %179, %181, %183, %185 in 0 : vector<2x8x8xf32>, vector<2x8x8xf32>, vector<2x8x8xf32>, vector<2x8x8xf32> -> vector<8x8x8xf32>
    %187 = arith.truncf %186 : vector<8x8x8xf32> to vector<8x8x8xbf16>
    "tpu.trace_start"() <{level = 10 : i32, message = "gqd,gkd->gqk"}> : () -> ()
    %cst_69 = arith.constant dense<0.000000e+00> : vector<8x8x8xf32>
    %188 = tpu.matmul %167, %177, %cst_69 {dimension_numbers = #tpu.dot_dimension_numbers<[2], [2], [1], [1], [0, 0, 0, 1, 1, 1], [0], [0]>} : vector<8x8x8xbf16>, vector<8x8x8xbf16>, vector<8x8x8xf32> -> vector<8x8x8xf32>
    "tpu.trace_stop"() : () -> ()
    %cst_70 = arith.constant dense<0xFF800000> : vector<8x8xf32>
    %189 = vector.multi_reduction <maximumf>, %188, %cst_70 [2] : vector<8x8x8xf32> to vector<8x8xf32>
    %190 = vector.shape_cast %189 : vector<8x8xf32> to vector<8x8x1xf32>
    %191 = vector.broadcast %190 : vector<8x8x1xf32> to vector<8x8x8xf32>
    %192 = arith.subf %188, %191 : vector<8x8x8xf32>
    %193 = math.exp %192 : vector<8x8x8xf32>
    %cst_71 = arith.constant dense<0.000000e+00> : vector<8x8xf32>
    %194 = vector.multi_reduction <add>, %193, %cst_71 [2] : vector<8x8x8xf32> to vector<8x8xf32>
    %195 = vector.shape_cast %194 : vector<8x8xf32> to vector<8x8x1xf32>
    %196 = tpu.reciprocal %195 {approx = true} : vector<8x8x1xf32> -> vector<8x8x1xf32>
    %197 = vector.broadcast %196 : vector<8x8x1xf32> to vector<8x8x8xf32>
    %198 = arith.mulf %193, %197 : vector<8x8x8xf32>
    %199 = arith.truncf %198 : vector<8x8x8xf32> to vector<8x8x8xbf16>
    "tpu.trace_start"() <{level = 10 : i32, message = "gqk,gkd->gqd"}> : () -> ()
    %cst_72 = arith.constant dense<0.000000e+00> : vector<8x8x8xf32>
    %200 = tpu.matmul %199, %187, %cst_72 {dimension_numbers = #tpu.dot_dimension_numbers<[2], [1], [1], [2], [0, 0, 0, 1, 1, 2], [0], [0]>} : vector<8x8x8xbf16>, vector<8x8x8xbf16>, vector<8x8x8xf32> -> vector<8x8x8xf32>
    "tpu.trace_stop"() : () -> ()
    %201 = vector.extract_strided_slice %200 {offsets = [0, 0, 0], sizes = [2, 8, 8], strides = [1, 1, 1]} : vector<8x8x8xf32> to vector<2x8x8xf32>
    %202 = vector.shape_cast %201 : vector<2x8x8xf32> to vector<16x8xf32>
    %c0_73 = arith.constant 0 : index
    %c0_74 = arith.constant 0 : index
    %203 = vector.load %arg16[%c0_73, %c0_74] : memref<16x32xf32, #tpu.memory_space<vmem>>, vector<16x8xf32>
    tpu.vector_store %arg16[%c0_73, %c0_74], %202 {strides = array<i32>} : memref<16x32xf32, #tpu.memory_space<vmem>>, vector<16x8xf32>,
    %204 = vector.extract_strided_slice %200 {offsets = [2, 0, 0], sizes = [2, 8, 8], strides = [1, 1, 1]} : vector<8x8x8xf32> to vector<2x8x8xf32>
    %205 = vector.shape_cast %204 : vector<2x8x8xf32> to vector<16x8xf32>
    %c0_75 = arith.constant 0 : index
    %c8_76 = arith.constant 8 : index
    %206 = vector.load %arg16[%c0_75, %c8_76] : memref<16x32xf32, #tpu.memory_space<vmem>>, vector<16x8xf32>
    tpu.vector_store %arg16[%c0_75, %c8_76], %205 {strides = array<i32>} : memref<16x32xf32, #tpu.memory_space<vmem>>, vector<16x8xf32>,
    %207 = vector.extract_strided_slice %200 {offsets = [4, 0, 0], sizes = [2, 8, 8], strides = [1, 1, 1]} : vector<8x8x8xf32> to vector<2x8x8xf32>
    %208 = vector.shape_cast %207 : vector<2x8x8xf32> to vector<16x8xf32>
    %c0_77 = arith.constant 0 : index
    %c16_78 = arith.constant 16 : index
    %209 = vector.load %arg16[%c0_77, %c16_78] : memref<16x32xf32, #tpu.memory_space<vmem>>, vector<16x8xf32>
    tpu.vector_store %arg16[%c0_77, %c16_78], %208 {strides = array<i32>} : memref<16x32xf32, #tpu.memory_space<vmem>>, vector<16x8xf32>,
    %210 = vector.extract_strided_slice %200 {offsets = [6, 0, 0], sizes = [2, 8, 8], strides = [1, 1, 1]} : vector<8x8x8xf32> to vector<2x8x8xf32>
    %211 = vector.shape_cast %210 : vector<2x8x8xf32> to vector<16x8xf32>
    %c0_79 = arith.constant 0 : index
    %c24_80 = arith.constant 24 : index
    %212 = vector.load %arg16[%c0_79, %c24_80] : memref<16x32xf32, #tpu.memory_space<vmem>>, vector<16x8xf32>
    tpu.vector_store %arg16[%c0_79, %c24_80], %211 {strides = array<i32>} : memref<16x32xf32, #tpu.memory_space<vmem>>, vector<16x8xf32>,
    %c0_81 = arith.constant 0 : index
    %c0_82 = arith.constant 0 : index
    %213 = vector.load %arg16[%c0_81, %c0_82] : memref<16x32xf32, #tpu.memory_space<vmem>>, vector<16x32xf32>
    %214 = arith.truncf %213 : vector<16x32xf32> to vector<16x32xbf16>
    %c1_83 = arith.constant 1 : index
    %c0_84 = arith.constant 0 : index
    %c0_85 = arith.constant 0 : index
    %215 = vector.load %arg3[%c1_83, %c0_84, %c0_85] : memref<2x32x32xbf16, #tpu.memory_space<vmem>>, vector<1x32x32xbf16>
    %216 = vector.shape_cast %215 : vector<1x32x32xbf16> to vector<32x32xbf16>
    %cst_86 = arith.constant dense<0.000000e+00> : vector<16x32xf32>
    %217 = tpu.matmul %214, %216, %cst_86 {dimension_numbers = #tpu.dot_dimension_numbers<[1], [0], [0], [1], [0, 0, 1, 1], [], []>} : vector<16x32xbf16>, vector<32x32xbf16>, vector<16x32xf32> -> vector<16x32xf32>
    %c1_87 = arith.constant 1 : index
    %c0_88 = arith.constant 0 : index
    %c0_89 = arith.constant 0 : index
    %218 = vector.load %arg4[%c1_87, %c0_88, %c0_89] : memref<2x1x32xf32, #tpu.memory_space<vmem>>, vector<1x1x32xf32>
    %219 = vector.shape_cast %218 : vector<1x1x32xf32> to vector<1x32xf32>
    %220 = vector.broadcast %219 : vector<1x32xf32> to vector<16x32xf32>
    %221 = arith.addf %217, %220 : vector<16x32xf32>
    %222 = arith.addf %149, %221 : vector<16x32xf32>
    %c1_90 = arith.constant 1 : index
    %c0_91 = arith.constant 0 : index
    %c0_92 = arith.constant 0 : index
    %223 = vector.load %arg5[%c1_90, %c0_91, %c0_92] : memref<2x1x32xf32, #tpu.memory_space<vmem>>, vector<1x1x32xf32>
    %224 = vector.shape_cast %223 : vector<1x1x32xf32> to vector<1x32xf32>
    %c1_93 = arith.constant 1 : index
    %c0_94 = arith.constant 0 : index
    %c0_95 = arith.constant 0 : index
    %225 = vector.load %arg6[%c1_93, %c0_94, %c0_95] : memref<2x1x32xf32, #tpu.memory_space<vmem>>, vector<1x1x32xf32>
    %226 = vector.shape_cast %225 : vector<1x1x32xf32> to vector<1x32xf32>
    %cst_96 = arith.constant dense<0.000000e+00> : vector<16xf32>
    %227 = vector.multi_reduction <add>, %222, %cst_96 [1] : vector<16x32xf32> to vector<16xf32>
    %228 = vector.shape_cast %227 : vector<16xf32> to vector<16x1xf32>
    %cst_97 = arith.constant 3.200000e+01 : f32
    %229 = vector.broadcast %cst_97 : f32 to vector<16x1xf32>
    %230 = arith.divf %228, %229 : vector<16x1xf32>
    %231 = vector.broadcast %230 : vector<16x1xf32> to vector<16x32xf32>
    %232 = arith.subf %222, %231 : vector<16x32xf32>
    %233 = vector.broadcast %230 : vector<16x1xf32> to vector<16x32xf32>
    %234 = arith.subf %222, %233 : vector<16x32xf32>
    %235 = arith.mulf %232, %234 : vector<16x32xf32>
    %cst_98 = arith.constant dense<0.000000e+00> : vector<16xf32>
    %236 = vector.multi_reduction <add>, %235, %cst_98 [1] : vector<16x32xf32> to vector<16xf32>
    %237 = vector.shape_cast %236 : vector<16xf32> to vector<16x1xf32>
    %cst_99 = arith.constant 3.200000e+01 : f32
    %238 = vector.broadcast %cst_99 : f32 to vector<16x1xf32>
    %239 = arith.divf %237, %238 : vector<16x1xf32>
    %240 = vector.broadcast %230 : vector<16x1xf32> to vector<16x32xf32>
    %241 = arith.subf %222, %240 : vector<16x32xf32>
    %cst_100 = arith.constant 9.99999974E-6 : f32
    %242 = vector.broadcast %cst_100 : f32 to vector<16x1xf32>
    %243 = arith.addf %239, %242 : vector<16x1xf32>
    %244 = math.rsqrt %243 : vector<16x1xf32>
    %245 = vector.broadcast %244 : vector<16x1xf32> to vector<16x32xf32>
    %246 = arith.mulf %241, %245 : vector<16x32xf32>
    %247 = vector.broadcast %224 : vector<1x32xf32> to vector<16x32xf32>
    %248 = arith.mulf %246, %247 : vector<16x32xf32>
    %249 = vector.broadcast %226 : vector<1x32xf32> to vector<16x32xf32>
    %250 = arith.addf %248, %249 : vector<16x32xf32>
    %251 = arith.truncf %250 : vector<16x32xf32> to vector<16x32xbf16>
    %c1_101 = arith.constant 1 : index
    %c0_102 = arith.constant 0 : index
    %c0_103 = arith.constant 0 : index
    %252 = vector.load %arg7[%c1_101, %c0_102, %c0_103] : memref<2x32x64xbf16, #tpu.memory_space<vmem>>, vector<1x32x64xbf16>
    %253 = vector.shape_cast %252 : vector<1x32x64xbf16> to vector<32x64xbf16>
    %cst_104 = arith.constant dense<0.000000e+00> : vector<16x64xf32>
    %254 = tpu.matmul %251, %253, %cst_104 {dimension_numbers = #tpu.dot_dimension_numbers<[1], [0], [0], [1], [0, 0, 1, 1], [], []>} : vector<16x32xbf16>, vector<32x64xbf16>, vector<16x64xf32> -> vector<16x64xf32>
    %c1_105 = arith.constant 1 : index
    %c0_106 = arith.constant 0 : index
    %c0_107 = arith.constant 0 : index
    %255 = vector.load %arg8[%c1_105, %c0_106, %c0_107] : memref<2x1x64xf32, #tpu.memory_space<vmem>>, vector<1x1x64xf32>
    %256 = vector.shape_cast %255 : vector<1x1x64xf32> to vector<1x64xf32>
    %257 = vector.broadcast %256 : vector<1x64xf32> to vector<16x64xf32>
    %258 = arith.addf %254, %257 : vector<16x64xf32>
    %cst_108 = arith.constant 0.000000e+00 : f32
    %259 = vector.broadcast %cst_108 : f32 to vector<16x64xf32>
    %260 = arith.maximumf %258, %259 : vector<16x64xf32>
    %261 = arith.truncf %260 : vector<16x64xf32> to vector<16x64xbf16>
    %c1_109 = arith.constant 1 : index
    %c0_110 = arith.constant 0 : index
    %c0_111 = arith.constant 0 : index
    %262 = vector.load %arg9[%c1_109, %c0_110, %c0_111] : memref<2x64x32xbf16, #tpu.memory_space<vmem>>, vector<1x64x32xbf16>
    %263 = vector.shape_cast %262 : vector<1x64x32xbf16> to vector<64x32xbf16>
    %cst_112 = arith.constant dense<0.000000e+00> : vector<16x32xf32>
    %264 = tpu.matmul %261, %263, %cst_112 {dimension_numbers = #tpu.dot_dimension_numbers<[1], [0], [0], [1], [0, 0, 1, 1], [], []>} : vector<16x64xbf16>, vector<64x32xbf16>, vector<16x32xf32> -> vector<16x32xf32>
    %c1_113 = arith.constant 1 : index
    %c0_114 = arith.constant 0 : index
    %c0_115 = arith.constant 0 : index
    %265 = vector.load %arg10[%c1_113, %c0_114, %c0_115] : memref<2x1x32xf32, #tpu.memory_space<vmem>>, vector<1x1x32xf32>
    %266 = vector.shape_cast %265 : vector<1x1x32xf32> to vector<1x32xf32>
    %267 = vector.broadcast %266 : vector<1x32xf32> to vector<16x32xf32>
    %268 = arith.addf %264, %267 : vector<16x32xf32>
    %269 = arith.addf %250, %268 : vector<16x32xf32>
    %c1_116 = arith.constant 1 : index
    %c0_117 = arith.constant 0 : index
    %c0_118 = arith.constant 0 : index
    %270 = vector.load %arg11[%c1_116, %c0_117, %c0_118] : memref<2x1x32xf32, #tpu.memory_space<vmem>>, vector<1x1x32xf32>
    %271 = vector.shape_cast %270 : vector<1x1x32xf32> to vector<1x32xf32>
    %c1_119 = arith.constant 1 : index
    %c0_120 = arith.constant 0 : index
    %c0_121 = arith.constant 0 : index
    %272 = vector.load %arg12[%c1_119, %c0_120, %c0_121] : memref<2x1x32xf32, #tpu.memory_space<vmem>>, vector<1x1x32xf32>
    %273 = vector.shape_cast %272 : vector<1x1x32xf32> to vector<1x32xf32>
    %cst_122 = arith.constant dense<0.000000e+00> : vector<16xf32>
    %274 = vector.multi_reduction <add>, %269, %cst_122 [1] : vector<16x32xf32> to vector<16xf32>
    %275 = vector.shape_cast %274 : vector<16xf32> to vector<16x1xf32>
    %cst_123 = arith.constant 3.200000e+01 : f32
    %276 = vector.broadcast %cst_123 : f32 to vector<16x1xf32>
    %277 = arith.divf %275, %276 : vector<16x1xf32>
    %278 = vector.broadcast %277 : vector<16x1xf32> to vector<16x32xf32>
    %279 = arith.subf %269, %278 : vector<16x32xf32>
    %280 = vector.broadcast %277 : vector<16x1xf32> to vector<16x32xf32>
    %281 = arith.subf %269, %280 : vector<16x32xf32>
    %282 = arith.mulf %279, %281 : vector<16x32xf32>
    %cst_124 = arith.constant dense<0.000000e+00> : vector<16xf32>
    %283 = vector.multi_reduction <add>, %282, %cst_124 [1] : vector<16x32xf32> to vector<16xf32>
    %284 = vector.shape_cast %283 : vector<16xf32> to vector<16x1xf32>
    %cst_125 = arith.constant 3.200000e+01 : f32
    %285 = vector.broadcast %cst_125 : f32 to vector<16x1xf32>
    %286 = arith.divf %284, %285 : vector<16x1xf32>
    %287 = vector.broadcast %277 : vector<16x1xf32> to vector<16x32xf32>
    %288 = arith.subf %269, %287 : vector<16x32xf32>
    %cst_126 = arith.constant 9.99999974E-6 : f32
    %289 = vector.broadcast %cst_126 : f32 to vector<16x1xf32>
    %290 = arith.addf %286, %289 : vector<16x1xf32>
    %291 = math.rsqrt %290 : vector<16x1xf32>
    %292 = vector.broadcast %291 : vector<16x1xf32> to vector<16x32xf32>
    %293 = arith.mulf %288, %292 : vector<16x32xf32>
    %294 = vector.broadcast %271 : vector<1x32xf32> to vector<16x32xf32>
    %295 = arith.mulf %293, %294 : vector<16x32xf32>
    %296 = vector.broadcast %273 : vector<1x32xf32> to vector<16x32xf32>
    %297 = arith.addf %295, %296 : vector<16x32xf32>
    %c0_127 = arith.constant 0 : index
    %c0_128 = arith.constant 0 : index
    %298 = vector.load %arg13[%c0_127, %c0_128] : memref<1x32xf32, #tpu.memory_space<vmem>>, vector<1x32xf32>
    %c0_129 = arith.constant 0 : index
    %c0_130 = arith.constant 0 : index
    %299 = vector.load %arg14[%c0_129, %c0_130] : memref<1x32xf32, #tpu.memory_space<vmem>>, vector<1x32xf32>
    %cst_131 = arith.constant dense<0.000000e+00> : vector<16xf32>
    %300 = vector.multi_reduction <add>, %297, %cst_131 [1] : vector<16x32xf32> to vector<16xf32>
    %301 = vector.shape_cast %300 : vector<16xf32> to vector<16x1xf32>
    %cst_132 = arith.constant 3.200000e+01 : f32
    %302 = vector.broadcast %cst_132 : f32 to vector<16x1xf32>
    %303 = arith.divf %301, %302 : vector<16x1xf32>
    %304 = vector.broadcast %303 : vector<16x1xf32> to vector<16x32xf32>
    %305 = arith.subf %297, %304 : vector<16x32xf32>
    %306 = vector.broadcast %303 : vector<16x1xf32> to vector<16x32xf32>
    %307 = arith.subf %297, %306 : vector<16x32xf32>
    %308 = arith.mulf %305, %307 : vector<16x32xf32>
    %cst_133 = arith.constant dense<0.000000e+00> : vector<16xf32>
    %309 = vector.multi_reduction <add>, %308, %cst_133 [1] : vector<16x32xf32> to vector<16xf32>
    %310 = vector.shape_cast %309 : vector<16xf32> to vector<16x1xf32>
    %cst_134 = arith.constant 3.200000e+01 : f32
    %311 = vector.broadcast %cst_134 : f32 to vector<16x1xf32>
    %312 = arith.divf %310, %311 : vector<16x1xf32>
    %313 = vector.broadcast %303 : vector<16x1xf32> to vector<16x32xf32>
    %314 = arith.subf %297, %313 : vector<16x32xf32>
    %cst_135 = arith.constant 9.99999974E-6 : f32
    %315 = vector.broadcast %cst_135 : f32 to vector<16x1xf32>
    %316 = arith.addf %312, %315 : vector<16x1xf32>
    %317 = math.rsqrt %316 : vector<16x1xf32>
    %318 = vector.broadcast %317 : vector<16x1xf32> to vector<16x32xf32>
    %319 = arith.mulf %314, %318 : vector<16x32xf32>
    %320 = vector.broadcast %298 : vector<1x32xf32> to vector<16x32xf32>
    %321 = arith.mulf %319, %320 : vector<16x32xf32>
    %322 = vector.broadcast %299 : vector<1x32xf32> to vector<16x32xf32>
    %323 = arith.addf %321, %322 : vector<16x32xf32>
    %324 = vector.shape_cast %323 : vector<16x32xf32> to vector<2x8x32xf32>
    %c0_136 = arith.constant 0 : index
    %c0_137 = arith.constant 0 : index
    %c0_138 = arith.constant 0 : index
    %325 = vector.load %arg15[%c0_136, %c0_137, %c0_138] : memref<2x8x32xf32, #tpu.memory_space<vmem>>, vector<2x8x32xf32>
    tpu.vector_store %arg15[%c0_136, %c0_137, %c0_138], %324 {strides = array<i32>} : memref<2x8x32xf32, #tpu.memory_space<vmem>>, vector<2x8x32xf32>,
    return
  }
}

</mosaic_0001>

<bundles_post_ra>
// kernel: tpu_custom_call.1
= control target key start
LH: loop header
LB: loop body
LE: loop exit
PB: predicated region body
PF: predicated region fallthrough
CT: control target
= control target key end

     0   :  { %20 = vsyncpa [#allocation4], 0  ;;  %s2778_s0 = inlined_call_operand.hbm [shape: f32[2,8,32], index: 0, kind: input, shape index: {}]   ;;  %s2779_s1 = inlined_call_operand.vmem [shape: bf16[2,32,96], index: 1, kind: input, shape index: {}]   ;;  %s2780_s2 = inlined_call_operand.hbm [shape: f32[2,1,96], index: 2, kind: input, shape index: {}]   ;;  %s2781_s3 = inlined_call_operand.vmem [shape: bf16[2,32,32], index: 3, kind: input, shape index: {}]   ;;  %s2782_s4 = inlined_call_operand.vmem [shape: f32[2,1,32], index: 4, kind: input, shape index: {}]   ;;  %s2783_s5 = inlined_call_operand.hbm [shape: f32[2,1,32], index: 5, kind: input, shape index: {}]   ;;  %s2784_s6 = inlined_call_operand.vmem [shape: f32[2,1,32], index: 6, kind: input, shape index: {}]   ;;  %s2785_s7 = inlined_call_operand.vmem [shape: bf16[2,32,64], index: 7, kind: input, shape index: {}]   ;;  %s2786_s8 = inlined_call_operand.vmem [shape: f32[2,1,64], index: 8, kind: input, shape index: {}]   ;;  %s2787_s9 = inlined_call_operand.vmem [shape: bf16[2,64,32], index: 9, kind: input, shape index: {}]   ;;  %s2788_s10 = inlined_call_operand.vmem [shape: f32[2,1,32], index: 10, kind: input, shape index: {}]   ;;  %s2789_s11 = inlined_call_operand.hbm [shape: f32[2,1,32], index: 11, kind: input, shape index: {}]   ;;  %s2790_s12 = inlined_call_operand.vmem [shape: f32[2,1,32], index: 12, kind: input, shape index: {}]   ;;  %s2791_s13 = inlined_call_operand.vmem [shape: f32[1,32], index: 13, kind: input, shape index: {}]   ;;  %s2792_s14 = inlined_call_operand.vmem [shape: f32[1,32], index: 14, kind: input, shape index: {}]   ;;  %s2793_s15 = inlined_call_operand.hbm [shape: f32[2,8,32], index: 15, kind: output, shape index: {}]  }
   0x1   :  { %21 = vsyncpa [#allocation7], 0 }
   0x2   :  { %22 = vsyncpa [#allocation10], 0  ;;  %s43_s20 = sshll.u32 %s2780_s2, 4  ;;  %s44_s20 = int_to_ptr.hbm [resolvable:$true] %s43_s20 }
   0x3   :  { %23 = vsyncpa [#allocation5], 0  ;;  %s2243_s21 = smov [#allocation6]   ;;  %s28_s25 = sshll.u32 %s2778_s0, 4  ;;  %s29_s25 = int_to_ptr.hbm [resolvable:$true] %s28_s25 }
   0x4   :  { %s45_s22 = sshll.u32 %s2243_s21, 4  ;;  %s2244_s26 = smov 16   ;;  %s46_s22 = int_to_ptr.vmem [resolvable:$true] %s45_s22 }
   0x5   :  { %s2245_s27 = smov 1   ;;  %s2246_s28 = smov [#allocation3]  }
   0x6   :  { %51 = dma.hbm_to_vmem [thread:$0]  %s44_s20, 32, %s46_s22, [#allocation7], %s2244_s26, %s2244_s26, %s2245_s27  }
   0x7   :  { %s30_s29 = sshll.u32 %s2246_s28, 4  ;;  %s2247_s30 = smov 128   ;;  %s31_s29 = int_to_ptr.vmem [resolvable:$true] %s30_s29 }
   0x8   :  { %s2248_s2 = smov 8   ;;  %s60_s18 = sshll.u32 %s2783_s5, 4  ;;  %s61_s18 = int_to_ptr.hbm [resolvable:$true] %s60_s18 }
   0x9   :  { %36 = dma.hbm_to_vmem [thread:$0]  %s29_s25, 256, %s31_s29, [#allocation4], %s2247_s30, %s2247_s30, %s2248_s2  }
   0xa   :  { %s2249_s0 = smov [#allocation8]   ;;  %s83_s22 = sshll.u32 %s2789_s11, 4  ;;  %s84_s22 = int_to_ptr.hbm [resolvable:$true] %s83_s22 }
   0xb   :  { %s62_s19 = sshll.u32 %s2249_s0, 4  ;;  %s2250_s23 = smov [#allocation9]   ;;  %s63_s19 = int_to_ptr.vmem [resolvable:$true] %s62_s19 }
   0xc   :  { %68 = dma.hbm_to_vmem [thread:$0]  %s61_s18, 32, %s63_s19, [#allocation7], %s2244_s26, %s2244_s26, %s2245_s27  }
   0xd   :  { %s85_s24 = sshll.u32 %s2250_s23, 4  ;;  %s86_s24 = int_to_ptr.vmem [resolvable:$true] %s85_s24 }
   0xe   :  { %91 = dma.hbm_to_vmem [thread:$0]  %s84_s22, 32, %s86_s24, [#allocation10], %s2244_s26, %s2244_s26, %s2245_s27  }
   0xf   :  { %2235 = dma.done.wait [#allocation4], 256  }
  0x10   :  { %2236 = vsyncadd [#allocation4], 4294967040 }
  0x11   :  { %2237 = dma.done.wait [#allocation7], 64  }
  0x12   :  { %2238 = vsyncadd [#allocation7], 4294967232 }
  0x13   :  { %2239 = dma.done.wait [#allocation10], 32  }
  0x14   :  { %2240 = vsyncadd [#allocation10], 4294967264  ;;  %v1976_v0 = vld [vmem:[%s2779_s1 + $0x8] sm:$0xff]  ;;  %v1975_v1 = vld [vmem:[%s2779_s1] sm:$0xff]  ;;  %vm138_vm0 = vcmask 261120   ;;  %s2251_s27 = smov 112  }
  0x15   :  { %v2366_v2 = vld [vmem:[#allocation3] sm:$0xff]  ;;  %v2368_v3 = vld [vmem:[#allocation3 + $0x8] sm:$0xff]  ;;  %148 = vmatpush.bf16.msra.mxu0 %v1976_v0  ;;  %v2011_v5 = vld [vmem:[#allocation6] ss:$0 sm:$0xff]  ;;  %s2252_s29 = smov 120   ;;  %s2253_s16 = smov 104  }
  0x16   :  { %v117_v4 = vpack.c.bf16 %v2368_v3, %v2366_v2  ;;  %s2254_s17 = smov 96   ;;  %vm189_vm1 = vcmask 64512   ;;  %s2255_s18 = smov 64   ;;  %vm478_vm2 = vcmask 1043456   ;;  %vm652_vm3 = vcmask 130112  }
  0x17   :  { %s2256_s0 = smov 24   ;;  %vm663_vm4 = vcmask 195712   ;;  %vm674_vm5 = vcmask 261312   ;;  %vm859_vm13 = vcmask 523264  }
  0x19   :  { %149 = vmatpush.bf16.msra.mxu0 %v1975_v1 }
  0x1c   :  { %1838 = vmatmul.msk.bf16.vlgmr.msra.gmra.mxu0 %vm138_vm0, %v117_v4 }
  0x99   :  { %v151_v6 = vpop.f32.mrf.mxu0 }
  0x9a   :  { %v152_v7 = vadd.f32 %v2011_v5, %v151_v6 }
  0x9c   :  { %164 = vrot.lane.b32.xlu2 %v152_v7, %s2251_s27  ;;  %158 = vrot.lane.b32.xlu0 %v152_v7, %s2252_s29  ;;  %v176_v10 = vpack.c.bf16 %v152_v7, %v152_v7 }
  0x9e   :  { %v185_v12 = vunpack.c.l.b16 %v176_v10 }
  0xa0   :  { %v186_v14 = vpack.c.b16 %v185_v12, %v185_v12 }
  0xa1   :  { %v153_v8 = vpop.f32.mrf.mxu0 }
  0xa2   :  { %v154_v9 = vadd.f32 %v2011_v5, %v153_v8 }
  0xa4   :  { %166 = vrot.lane.b32.xlu1 %v154_v9, %s2251_s27  ;;  %172 = vrot.lane.b32.xlu2 %v154_v9, %s2253_s16  ;;  %v177_v11 = vpack.c.bf16 %v154_v9, %v154_v9 }
  0xa5   :  { %160 = vrot.lane.b32.xlu0 %v154_v9, %s2252_s29 }
  0xa6   :  { %v210_v13 = vunpack.c.l.b16 %v177_v11 }
  0xa8   :  { %v211_v15 = vpack.c.b16 %v210_v13, %v210_v13 }
  0xac   :  { %170 = vrot.lane.b32.xlu1 %v152_v7, %s2253_s16  ;;  %187 = vrot.lane.b32.xlu2 %v186_v14, %s2254_s17 }
  0xad   :  { %212 = vrot.lane.b32.xlu0 %v211_v15, %s2254_s17 }
  0xf6   :  { %v165_v16 = vpop.permute.xlu2 %164 }
  0xf7   :  { %v180_v32 = vpack.c.bf16 %v165_v16, %v165_v16 }
  0xf9   :  { %v282_v38 = vunpack.c.l.b16 %v180_v32 }
  0xfb   :  { %v2397_v43 = vpack.c.b16 %v282_v38, %v282_v38 }
  0xfe   :  { %v173_v17 = vpop.permute.xlu2 %172 }
  0xff   :  { %v2384_v30 = vpack.c.bf16 %v173_v17, %v173_v17 }
 0x101   :  { %v354_v35 = vunpack.c.l.b16 %v2384_v30 }
 0x103   :  { %v2393_v41 = vpack.c.b16 %v354_v35, %v354_v35 }
 0x106   :  { %v188_v18 = vpop.permute.xlu2 %187 }
 0x107   :  { %v194_v19 = vsel %vm189_vm1, %v188_v18, 0 }
 0x108   :  { %203 = vmatpush.bf16.xpose.msra.mxu1 %v194_v19 }
 0x10e   :  { %v159_v20 = vpop.permute.xlu0 %158 }
 0x10f   :  { %v178_v21 = vpack.c.bf16 %v159_v20, %v159_v20  ;;  %1839 = vmatmul.msk.bf16.vlgmr.msra.gmra.mxu1 %vm189_vm1, %v176_v10 }
 0x111   :  { %v234_v22 = vunpack.c.l.b16 %v178_v21 }
 0x113   :  { %v235_v23 = vpack.c.b16 %v234_v22, %v234_v22 }
 0x115   :  { %236 = vrot.lane.b32.xlu1 %v235_v23, %s2254_s17 }
 0x116   :  { %v167_v24 = vpop.permute.xlu1 %166 }
 0x117   :  { %v181_v25 = vpack.c.bf16 %v167_v24, %v167_v24  ;;  %v161_v26 = vpop.permute.xlu0 %160 }
 0x118   :  { %v179_v27 = vpack.c.bf16 %v161_v26, %v161_v26 }
 0x119   :  { %v306_v28 = vunpack.c.l.b16 %v181_v25 }
 0x11a   :  { %v258_v29 = vunpack.c.l.b16 %v179_v27 }
 0x11b   :  { %v2386_v31 = vpack.c.b16 %v306_v28, %v306_v28 }
 0x11c   :  { %v259_v33 = vpack.c.b16 %v258_v29, %v258_v29 }
 0x11d   :  { %308 = vrot.lane.b32.xlu1 %v2386_v31, %s2254_s17 }
 0x11e   :  { %260 = vrot.lane.b32.xlu0 %v259_v33, %s2254_s17  ;;  %v171_v34 = vpop.permute.xlu1 %170 }
 0x11f   :  { %v182_v36 = vpack.c.bf16 %v171_v34, %v171_v34  ;;  %v213_v37 = vpop.permute.xlu0 %212 }
 0x120   :  { %v218_v39 = vsel %vm189_vm1, %v213_v37, 0 }
 0x121   :  { %v330_v40 = vunpack.c.l.b16 %v182_v36  ;;  %227 = vmatpush.bf16.xpose.msra.mxu2 %v218_v39 }
 0x123   :  { %v2395_v42 = vpack.c.b16 %v330_v40, %v330_v40 }
 0x125   :  { %356 = vrot.lane.b32.xlu1 %v2393_v41, %s2254_s17  ;;  %332 = vrot.lane.b32.xlu2 %v2395_v42, %s2254_s17 }
 0x126   :  { %284 = vrot.lane.b32.xlu0 %v2397_v43, %s2254_s17 }
 0x128   :  { %1840 = vmatmul.msk.bf16.vlgmr.msra.gmra.mxu2 %vm189_vm1, %v177_v11 }
 0x12d   :  { %495 = vrot.lane.b32.xlu1 %v211_v15, %s2255_s18  ;;  %516 = vrot.lane.b32.xlu2 %v235_v23, %s2255_s18 }
 0x12e   :  { %473 = vrot.lane.b32.xlu0 %v186_v14, %s2255_s18 }
 0x17f   :  { %v333_v44 = vpop.permute.xlu2 %332 }
 0x180   :  { %v338_v47 = vsel %vm189_vm1, %v333_v44, 0 }
 0x187   :  { %v237_v45 = vpop.permute.xlu1 %236  ;;  %v517_v49 = vpop.permute.xlu2 %516 }
 0x188   :  { %v242_v46 = vsel %vm189_vm1, %v237_v45, 0  ;;  %v522_v52 = vsel %vm478_vm2, %v517_v49, 0 }
 0x189   :  { %251 = vmatpush.bf16.xpose.msra.mxu3 %v242_v46 }
 0x18c   :  { %v205_v48 = vpop.f32.mrf.mxu1 }
 0x18d   :  { %v377_v50 = vsel %vm189_vm1, %v205_v48, -inf }
 0x18e   :  { %378 = vmax.xlane.f32.xlu1 %v377_v50 }
 0x18f   :  { %v309_v51 = vpop.permute.xlu1 %308 }
 0x190   :  { %v261_v53 = vpop.permute.xlu0 %260  ;;  %1841 = vmatmul.msk.bf16.vlgmr.msra.gmra.mxu3 %vm189_vm1, %v178_v21  ;;  %v314_v54 = vsel %vm189_vm1, %v309_v51, 0 }
 0x191   :  { %347 = vmatpush.bf16.xpose.msrb.mxu3 %v338_v47  ;;  %v266_v55 = vsel %vm189_vm1, %v261_v53, 0  ;;  %323 = vmatpush.bf16.xpose.msrb.mxu2 %v314_v54 }
 0x192   :  { %275 = vmatpush.bf16.xpose.msrb.mxu0 %v266_v55 }
 0x194   :  { %v207_v56 = vpop.f32.mrf.mxu1 }
 0x197   :  { %v357_v57 = vpop.permute.xlu1 %356 }
 0x198   :  { %v362_v58 = vsel %vm189_vm1, %v357_v57, 0  ;;  %v285_v59 = vpop.permute.xlu0 %284  ;;  %1844 = vmatmul.msk.bf16.vlgmr.msrb.gmra.mxu2 %vm189_vm1, %v181_v25 }
 0x199   :  { %531 = vmatpush.bf16.msra.mxu3 %v522_v52  ;;  %1842 = vmatmul.msk.bf16.vlgmr.msrb.gmra.mxu0 %vm189_vm1, %v179_v27  ;;  %v290_v60 = vsel %vm189_vm1, %v285_v59, 0 }
 0x19a   :  { %299 = vmatpush.bf16.xpose.msrb.mxu1 %v290_v60  ;;  %371 = vmatpush.bf16.xpose.msra.mxu0 %v362_v58 }
 0x19f   :  { %v496_v61 = vpop.permute.xlu1 %495 }
 0x1a0   :  { %v501_v62 = vsel %vm478_vm2, %v496_v61, 0  ;;  %v474_v63 = vpop.permute.xlu0 %473  ;;  %1845 = vmatmul.msk.bf16.vlgmr.msrb.gmra.mxu3 %vm189_vm1, %v182_v36 }
 0x1a1   :  { %v480_v0 = vsel %vm478_vm2, %v474_v63, 0  ;;  %1843 = vmatmul.msk.bf16.vlgmr.msrb.gmra.mxu1 %vm189_vm1, %v180_v32  ;;  %510 = vmatpush.bf16.msra.mxu2 %v501_v62 }
 0x1a2   :  { %489 = vmatpush.bf16.msra.mxu1 %v480_v0 }
 0x1a7   :  { %537 = vrot.lane.b32.xlu1 %v259_v33, %s2255_s18 }
 0x1a9   :  { %1846 = vmatmul.msk.bf16.vlgmr.msra.gmra.mxu0 %vm189_vm1, %v2384_v30 }
 0x1ab   :  { %v229_v1 = vpop.f32.mrf.mxu2 }
 0x1ac   :  { %v380_v4 = vsel %vm189_vm1, %v229_v1, -inf }
 0x1ad   :  { %381 = vmax.xlane.f32.xlu2 %v380_v4 }
 0x1b3   :  { %v231_v5 = vpop.f32.mrf.mxu2 }
 0x201   :  { %v379_v6 = vpop.xlane.xlu1 %378 }
 0x202   :  { %v401_v7 = vsub.f32 %v205_v48, %v379_v6 }
 0x204   :  { %v409_v8 = vmul.f32 1.442695, %v401_v7 }
 0x206   :  { %2029 = vpow2.f32 %v409_v8 }
 0x20c   :  { %v2030_v17 = vpop.eup %2029 }
 0x20d   :  { %v425_v20 = vsel %vm189_vm1, %v2030_v17, 0.0 }
 0x213   :  { %v253_v9 = vpop.f32.mrf.mxu3 }
 0x214   :  { %v383_v10 = vsel %vm189_vm1, %v253_v9, -inf }
 0x215   :  { %384 = vmax.xlane.f32.xlu0 %v383_v10 }
 0x216   :  { %v277_v11 = vpop.f32.mrf.mxu0 }
 0x217   :  { %v386_v12 = vsel %vm189_vm1, %v277_v11, -inf }
 0x218   :  { %387 = vmax.xlane.f32.xlu2 %v386_v12 }
 0x219   :  { %v538_v13 = vpop.permute.xlu1 %537 }
 0x21a   :  { %v543_v14 = vsel %vm478_vm2, %v538_v13, 0 }
 0x21b   :  { %v255_v15 = vpop.f32.mrf.mxu3  ;;  %v325_v16 = vpop.f32.mrf.mxu2  ;;  %552 = vmatpush.bf16.msrb.mxu0 %v543_v14 }
 0x21c   :  { %v392_v30 = vsel %vm189_vm1, %v325_v16, -inf }
 0x21e   :  { %v279_v18 = vpop.f32.mrf.mxu0  ;;  %v301_v19 = vpop.f32.mrf.mxu1 }
 0x21f   :  { %v389_v21 = vsel %vm189_vm1, %v301_v19, -inf }
 0x220   :  { %426 = vadd.xlane.f32.xlu2 %v425_v20  ;;  %390 = vmax.xlane.f32.xlu1 %v389_v21  ;;  %v382_v22 = vpop.xlane.xlu2 %381 }
 0x221   :  { %v402_v23 = vsub.f32 %v229_v1, %v382_v22 }
 0x223   :  { %v411_v24 = vmul.f32 1.442695, %v402_v23  ;;  %v327_v25 = vpop.f32.mrf.mxu2  ;;  %v349_v26 = vpop.f32.mrf.mxu3 }
 0x224   :  { %v395_v27 = vsel %vm189_vm1, %v349_v26, -inf }
 0x225   :  { %2031 = vpow2.f32 %v411_v24  ;;  %396 = vmax.xlane.f32.xlu0 %v395_v27 }
 0x226   :  { %v303_v28 = vpop.f32.mrf.mxu1  ;;  %v373_v29 = vpop.f32.mrf.mxu0 }
 0x227   :  { %v398_v36 = vsel %vm189_vm1, %v373_v29, -inf }
 0x228   :  { %393 = vmax.xlane.f32.xlu2 %v392_v30 }
 0x22b   :  { %v2032_v32 = vpop.eup %2031  ;;  %v351_v33 = vpop.f32.mrf.mxu3 }
 0x22c   :  { %v428_v34 = vsel %vm189_vm1, %v2032_v32, 0.0 }
 0x22d   :  { %429 = vadd.xlane.f32.xlu0 %v428_v34 }
 0x22e   :  { %v375_v35 = vpop.f32.mrf.mxu0 }
 0x230   :  { %399 = vmax.xlane.f32.xlu2 %v398_v36 }
 0x248   :  { %579 = vrot.lane.b32.xlu2 %v2386_v31, %s2255_s18 }
 0x288   :  { %v385_v40 = vpop.xlane.xlu0 %384 }
 0x289   :  { %v403_v48 = vsub.f32 %v253_v9, %v385_v40 }
 0x28b   :  { %v388_v37 = vpop.xlane.xlu2 %387  ;;  %v413_v31 = vmul.f32 1.442695, %v403_v48 }
 0x28c   :  { %v404_v38 = vsub.f32 %v277_v11, %v388_v37 }
 0x28e   :  { %v415_v39 = vmul.f32 1.442695, %v404_v38 }
 0x290   :  { %2033 = vpow2.f32 %v415_v39 }
 0x293   :  { %v391_v44 = vpop.xlane.xlu1 %390  ;;  %v427_v45 = vpop.xlane.xlu2 %426 }
 0x294   :  { %v405_v46 = vsub.f32 %v301_v19, %v391_v44  ;;  %2035 = vrcp.f32 %v427_v45 }
 0x296   :  { %v2034_v47 = vpop.eup %2033  ;;  %v417_v49 = vmul.f32 1.442695, %v405_v46 }
 0x297   :  { %v434_v50 = vsel %vm189_vm1, %v2034_v47, 0.0 }
 0x298   :  { %2037 = vpow2.f32 %v417_v49  ;;  %435 = vadd.xlane.f32.xlu0 %v434_v50  ;;  %v397_v51 = vpop.xlane.xlu0 %396 }
 0x299   :  { %v407_v52 = vsub.f32 %v349_v26, %v397_v51 }
 0x29a   :  { %v2036_v53 = vpop.eup %2035 }
 0x29b   :  { %v457_v54 = vmul.f32 %v2036_v53, %v2030_v17  ;;  %v421_v55 = vmul.f32 1.442695, %v407_v52  ;;  %v394_v56 = vpop.xlane.xlu2 %393 }
 0x29c   :  { %v406_v57 = vsub.f32 %v325_v16, %v394_v56 }
 0x29d   :  { %v465_v58 = vpack.c.bf16 %v457_v54, %v457_v54  ;;  %2039 = vpow2.f32 %v421_v55 }
 0x29e   :  { %v2440_v59 = vpop.eup %2037  ;;  %2041 = vpow2.f32 %v413_v31  ;;  %v419_v60 = vmul.f32 1.442695, %v406_v57 }
 0x29f   :  { %1847 = vmatmul.msk.bf16.vlgmr.msra.gmra.mxu1 %vm189_vm1, %v465_v58  ;;  %v437_v61 = vsel %vm189_vm1, %v2440_v59, 0.0 }
 0x2a0   :  { %2043 = vpow2.f32 %v419_v60  ;;  %438 = vadd.xlane.f32.xlu1 %v437_v61  ;;  %v430_v62 = vpop.xlane.xlu0 %429 }
 0x2a1   :  { %2045 = vrcp.f32 %v430_v62 }
 0x2a3   :  { %v2445_v63 = vpop.eup %2039  ;;  %v400_v0 = vpop.xlane.xlu2 %399 }
 0x2a4   :  { %v2042_v1 = vpop.eup %2041  ;;  %v408_v4 = vsub.f32 %v373_v29, %v400_v0  ;;  %v443_v5 = vsel %vm189_vm1, %v2445_v63, 0.0  ;;  %v1978_v0 = vld [vmem:[%s2781_s3 + $0x8] sm:$0xff] }
 0x2a5   :  { %444 = vadd.xlane.f32.xlu2 %v443_v5  ;;  %v431_v9 = vsel %vm189_vm1, %v2042_v1, 0.0 }
 0x2a6   :  { %v2044_v6 = vpop.eup %2043  ;;  %v423_v7 = vmul.f32 1.442695, %v408_v4 }
 0x2a7   :  { %v2046_v8 = vpop.eup %2045  ;;  %v440_v10 = vsel %vm189_vm1, %v2044_v6, 0.0 }
 0x2a8   :  { %v458_v11 = vmul.f32 %v2046_v8, %v2032_v32  ;;  %2047 = vpow2.f32 %v423_v7  ;;  %432 = vadd.xlane.f32.xlu1 %v431_v9  ;;  %441 = vadd.xlane.f32.xlu0 %v440_v10 }
 0x2aa   :  { %v466_v12 = vpack.c.bf16 %v458_v11, %v458_v11 }
 0x2ab   :  { %v580_v13 = vpop.permute.xlu2 %579 }
 0x2ac   :  { %v585_v14 = vsel %vm478_vm2, %v580_v13, 0  ;;  %1848 = vmatmul.msk.bf16.vlgmr.msra.gmra.mxu2 %vm189_vm1, %v466_v12  ;;  %v2012_v12 = vld [vmem:[%s2782_s4] ss:$0 sm:$0xff] }
 0x2ad   :  { %594 = vmatpush.bf16.msrb.mxu2 %v585_v14 }
 0x2ae   :  { %v2048_v15 = vpop.eup %2047 }
 0x2af   :  { %v446_v16 = vsel %vm189_vm1, %v2048_v15, 0.0 }
 0x2b0   :  { %447 = vadd.xlane.f32.xlu0 %v446_v16 }
 0x2bd   :  { %621 = vrot.lane.b32.xlu2 %v2393_v41, %s2255_s18 }
 0x2c1   :  { %600 = vrot.lane.b32.xlu1 %v2395_v42, %s2255_s18 }
 0x2c4   :  { %558 = vrot.lane.b32.xlu0 %v2397_v43, %s2255_s18 }
 0x30b   :  { %v436_v17 = vpop.xlane.xlu0 %435 }
 0x30c   :  { %2049 = vrcp.f32 %v436_v17 }
 0x312   :  { %v2050_v18 = vpop.eup %2049 }
 0x313   :  { %v460_v19 = vmul.f32 %v2050_v18, %v2034_v47  ;;  %v439_v20 = vpop.xlane.xlu1 %438 }
 0x315   :  { %v468_v21 = vpack.c.bf16 %v460_v19, %v460_v19 }
 0x317   :  { %1850 = vmatmul.msk.bf16.vlgmr.msrb.gmra.mxu0 %vm189_vm1, %v468_v21  ;;  %v2257_v21 = vmov 32.0  }
 0x318   :  { %v445_v22 = vpop.xlane.xlu2 %444 }
 0x31b   :  { %v433_v23 = vpop.xlane.xlu1 %432  ;;  %v442_v24 = vpop.xlane.xlu0 %441 }
 0x31c   :  { %2051 = vrcp.f32 %v433_v23  ;;  %v491_v25 = vpop.f32.mrf.mxu1 }
 0x31d   :  { %2053 = vrcp.f32 %v442_v24  ;;  %642 = vst.msk [vmem:[#allocation2] sm:$0xff] %vm189_vm1, %v491_v25 }
 0x320   :  { %v622_v41 = vpop.permute.xlu2 %621 }
 0x321   :  { %v627_v42 = vsel %vm478_vm2, %v622_v41, 0 }
 0x322   :  { %v2052_v43 = vpop.eup %2051  ;;  %636 = vmatpush.bf16.msra.mxu0 %v627_v42 }
 0x323   :  { %v2054_v26 = vpop.eup %2053  ;;  %v459_v27 = vmul.f32 %v2052_v43, %v2042_v1  ;;  %v448_v28 = vpop.xlane.xlu0 %447  ;;  %v1977_v1 = vld [vmem:[%s2781_s3] sm:$0xff] }
 0x324   :  { %v462_v29 = vmul.f32 %v2054_v26, %v2044_v6  ;;  %2055 = vrcp.f32 %v448_v28  ;;  %v493_v30 = vpop.f32.mrf.mxu1 }
 0x325   :  { %v467_v32 = vpack.c.bf16 %v459_v27, %v459_v27  ;;  %2057 = vrcp.f32 %v445_v22 }
 0x326   :  { %v470_v33 = vpack.c.bf16 %v462_v29, %v462_v29  ;;  %2059 = vrcp.f32 %v439_v20 }
 0x327   :  { %1849 = vmatmul.msk.bf16.vlgmr.msra.gmra.mxu3 %vm189_vm1, %v467_v32  ;;  %2061 = vrcp.f32 %v2257_v21 }
 0x328   :  { %1852 = vmatmul.msk.bf16.vlgmr.msrb.gmra.mxu2 %vm189_vm1, %v470_v33 }
 0x32a   :  { %v2056_v34 = vpop.eup %2055 }
 0x32b   :  { %v464_v35 = vmul.f32 %v2056_v34, %v2048_v15  ;;  %v2058_v37 = vpop.eup %2057  ;;  %v1980_v34 = vld [vmem:[%s2785_s7 + $0x8] sm:$0xff] }
 0x32c   :  { %v2060_v39 = vpop.eup %2059  ;;  %v463_v40 = vmul.f32 %v2058_v37, %v2445_v63  ;;  %812 = vmatpush.bf16.msra.mxu2 %v1980_v34 }
 0x32d   :  { %v472_v36 = vpack.c.bf16 %v464_v35, %v464_v35  ;;  %v461_v46 = vmul.f32 %v2060_v39, %v2440_v59  ;;  %v2062_v22 = vpop.eup %2061 }
 0x32e   :  { %v471_v47 = vpack.c.bf16 %v463_v40, %v463_v40  ;;  %v728_v23 = vmul.f32 32.0, %v2062_v22  ;;  %vm732_vm6 = vweird.f32 %v2062_v22 }
 0x32f   :  { %1854 = vmatmul.msk.bf16.vlgmr.msra.gmra.mxu0 %vm189_vm1, %v472_v36  ;;  %v512_v38 = vpop.f32.mrf.mxu2  ;;  %v469_v51 = vpack.c.bf16 %v461_v46, %v461_v46 }
 0x330   :  { %643 = vst.msk [vmem:[#allocation2 + $0x8] sm:$0xff] %vm189_vm1, %v512_v38  ;;  %v729_v24 = vsub.f32 1.0, %v728_v23  ;;  %v1979_v38 = vld [vmem:[%s2785_s7] sm:$0xff] }
 0x331   :  { %813 = vmatpush.bf16.msra.mxu2 %v1979_v38 }
 0x332   :  { %v730_v25 = vmul.f32 %v2062_v22, %v729_v24 }
 0x333   :  { %v601_v44 = vpop.permute.xlu1 %600 }
 0x334   :  { %v606_v45 = vsel %vm478_vm2, %v601_v44, 0  ;;  %v731_v41 = vadd.f32 %v2062_v22, %v730_v25 }
 0x335   :  { %615 = vmatpush.bf16.msrb.mxu3 %v606_v45 }
 0x336   :  { %v559_v48 = vpop.permute.xlu0 %558  ;;  %v2499_v42 = vsel %vm732_vm6, %v2062_v22, %v731_v41 }
 0x337   :  { %v564_v49 = vsel %vm478_vm2, %v559_v48, 0  ;;  %v514_v50 = vpop.f32.mrf.mxu2 }
 0x338   :  { %573 = vmatpush.bf16.msrb.mxu1 %v564_v49  ;;  %1853 = vmatmul.msk.bf16.vlgmr.msrb.gmra.mxu3 %vm189_vm1, %v471_v47 }
 0x33b   :  { %1851 = vmatmul.msk.bf16.vlgmr.msrb.gmra.mxu1 %vm189_vm1, %v469_v51 }
 0x33c   :  { %709 = vmatpush.bf16.msra.mxu1 %v1978_v0 }
 0x340   :  { %710 = vmatpush.bf16.msra.mxu1 %v1977_v1 }
 0x394   :  { %v554_v52 = vpop.f32.mrf.mxu0 }
 0x395   :  { %648 = vrot.lane.b32.xlu1 %v554_v52, %s2248_s2 }
 0x39c   :  { %v556_v53 = vpop.f32.mrf.mxu0 }
 0x3aa   :  { %v533_v31 = vpop.f32.mrf.mxu3 }
 0x3ab   :  { %v596_v54 = vpop.f32.mrf.mxu2  ;;  %646 = vrot.lane.b32.xlu0 %v533_v31, %s2248_s2 }
 0x3ac   :  { %v638_v55 = vpop.f32.mrf.mxu0 }
 0x3b2   :  { %v535_v56 = vpop.f32.mrf.mxu3 }
 0x3b3   :  { %v598_v57 = vpop.f32.mrf.mxu2  ;;  %659 = vrot.lane.b32.xlu0 %v596_v54, %s2244_s26  ;;  %v2013_v56 = vld [vmem:[#allocation8] ss:$0 sm:$0xff] }
 0x3b4   :  { %v640_v58 = vpop.f32.mrf.mxu0 }
 0x3b8   :  { %v575_v59 = vpop.f32.mrf.mxu1 }
 0x3b9   :  { %657 = vrot.lane.b32.xlu2 %v575_v59, %s2244_s26 }
 0x3bb   :  { %v617_v60 = vpop.f32.mrf.mxu3 }
 0x3bc   :  { %668 = vrot.lane.b32.xlu1 %v617_v60, %s2256_s0  ;;  %v2014_v60 = vld [vmem:[%s2784_s6] ss:$0 sm:$0xff] }
 0x3c0   :  { %v577_v61 = vpop.f32.mrf.mxu1 }
 0x3c1   :  { %670 = vrot.lane.b32.xlu2 %v638_v55, %s2256_s0 }
 0x3c3   :  { %v619_v62 = vpop.f32.mrf.mxu3 }
 0x407   :  { %v649_v63 = vpop.permute.xlu1 %648 }
 0x408   :  { %654 = vst.msk [vmem:[#allocation2 + $0x8] sm:$0xff] %vm652_vm3, %v649_v63 }
 0x413   :  { %v658_v4 = vpop.permute.xlu2 %657 }
 0x41b   :  { %v671_v7 = vpop.permute.xlu2 %670 }
 0x41d   :  { %v647_v5 = vpop.permute.xlu0 %646 }
 0x41e   :  { %653 = vst.msk [vmem:[#allocation2] sm:$0xff] %vm652_vm3, %v647_v5  ;;  %v1984_v5 = vld [vmem:[%s2787_s9 + $0x18] sm:$0xff] }
 0x41f   :  { %664 = vst.msk [vmem:[#allocation2] sm:$0xff] %vm663_vm4, %v658_v4  ;;  %867 = vmatpush.bf16.msra.mxu3 %v1984_v5 }
 0x425   :  { %v660_v6 = vpop.permute.xlu0 %659 }
 0x426   :  { %665 = vst.msk [vmem:[#allocation2 + $0x8] sm:$0xff] %vm663_vm4, %v660_v6  ;;  %v1983_v6 = vld [vmem:[%s2787_s9 + $0x10] sm:$0xff] }
 0x427   :  { %676 = vst.msk [vmem:[#allocation2 + $0x8] sm:$0xff] %vm674_vm5, %v671_v7  ;;  %868 = vmatpush.bf16.msra.mxu3 %v1983_v6  ;;  %v1982_v7 = vld [vmem:[%s2787_s9 + $0x8] sm:$0xff] }
 0x42b   :  { %869 = vmatpush.bf16.msra.mxu3 %v1982_v7 }
 0x42e   :  { %v669_v8 = vpop.permute.xlu1 %668  ;;  %v678_v10 = vld [vmem:[#allocation2 + $0x8] sm:$0xff] }
 0x42f   :  { %675 = vst.msk [vmem:[#allocation2] sm:$0xff] %vm674_vm5, %v669_v8  ;;  %v1981_v8 = vld [vmem:[%s2787_s9] sm:$0xff] }
 0x430   :  { %870 = vmatpush.bf16.msra.mxu3 %v1981_v8 }
 0x436   :  { %v677_v9 = vld [vmem:[#allocation2] sm:$0xff] }
 0x437   :  { %v679_v11 = vpack.c.bf16 %v678_v10, %v677_v9  ;;  %v2015_v10 = vld [vmem:[%s2786_s8] ss:$0 sm:$0xff] }
 0x439   :  { %1863 = vmatmul.msk.bf16.vlgmr.msra.gmra.mxu1 %vm138_vm0, %v679_v11 }
 0x4b6   :  { %v712_v13 = vpop.f32.mrf.mxu1 }
 0x4b7   :  { %v713_v14 = vadd.f32 %v2012_v12, %v712_v13 }
 0x4b9   :  { %v717_v15 = vadd.f32 %v713_v14, %v2366_v2 }
 0x4bb   :  { %v721_v16 = vsel %vm138_vm0, %v717_v15, 0.0 }
 0x4bc   :  { %722 = vadd.xlane.f32.xlu0 %v721_v16 }
 0x4be   :  { %v714_v17 = vpop.f32.mrf.mxu1 }
 0x4bf   :  { %v715_v18 = vadd.f32 %v2012_v12, %v714_v17  ;;  %v2016_v17 = vld [vmem:[%s2788_s10] ss:$0 sm:$0xff] }
 0x4c1   :  { %v718_v19 = vadd.f32 %v715_v18, %v2368_v3 }
 0x4c3   :  { %v724_v20 = vsel %vm138_vm0, %v718_v19, 0.0 }
 0x4c4   :  { %725 = vadd.xlane.f32.xlu1 %v724_v20 }
 0x52f   :  { %v723_v2 = vpop.xlane.xlu0 %722 }
 0x530   :  { %v734_v43 = vmul.f32 %v2499_v42, %v723_v2 }
 0x532   :  { %v736_v26 = vsub.f32 %v717_v15, %v734_v43 }
 0x534   :  { %v738_v27 = vmul.f32 %v736_v26, %v736_v26 }
 0x536   :  { %v740_v3 = vsel %vm138_vm0, %v738_v27, 0.0 }
 0x537   :  { %v726_v28 = vpop.xlane.xlu1 %725  ;;  %741 = vadd.xlane.f32.xlu2 %v740_v3 }
 0x538   :  { %v735_v29 = vmul.f32 %v2499_v42, %v726_v28 }
 0x53a   :  { %v737_v30 = vsub.f32 %v718_v19, %v735_v29 }
 0x53c   :  { %v739_v32 = vmul.f32 %v737_v30, %v737_v30 }
 0x53e   :  { %v743_v33 = vsel %vm138_vm0, %v739_v32, 0.0 }
 0x53f   :  { %744 = vadd.xlane.f32.xlu0 %v743_v33  ;;  %v1986_v33 = vld [vmem:[%s2779_s1 + $0x18] sm:$0xff] }
 0x540   :  { %967 = vmatpush.bf16.msrb.mxu0 %v1986_v33 }
 0x5aa   :  { %v742_v35 = vpop.xlane.xlu2 %741 }
 0x5ab   :  { %v746_v36 = vmul.f32 %v742_v35, %v2499_v42 }
 0x5ad   :  { %v748_v37 = vadd.f32 1e-05, %v746_v36 }
 0x5af   :  { %2063 = vrsqrt.f32 %v748_v37  ;;  %vm756_vm8 = vweird.f32 %v748_v37 }
 0x5b2   :  { %v745_v39 = vpop.xlane.xlu0 %744 }
 0x5b3   :  { %v747_v40 = vmul.f32 %v745_v39, %v2499_v42 }
 0x5b5   :  { %v2064_v44 = vpop.eup %2063  ;;  %v749_v45 = vadd.f32 1e-05, %v747_v40 }
 0x5b6   :  { %v751_v46 = vmul.f32 %v2064_v44, %v748_v37  ;;  %vm757_vm7 = vweird.f32 %v2064_v44  ;;  %v1985_v37 = vld [vmem:[%s2779_s1 + $0x10] sm:$0xff] }
 0x5b7   :  { %2065 = vrsqrt.f32 %v749_v45  ;;  %vm758_vm9 = vmor %vm756_vm8, %vm757_vm7  ;;  %vm766_vm11 = vweird.f32 %v749_v45  ;;  %968 = vmatpush.bf16.msrb.mxu0 %v1985_v37 }
 0x5b8   :  { %v752_v47 = vmul.f32 %v2064_v44, %v751_v46 }
 0x5ba   :  { %v753_v48 = vmul.f32 0.5, %v752_v47 }
 0x5bc   :  { %v754_v49 = vsub.f32 1.5, %v753_v48 }
 0x5bd   :  { %v2066_v50 = vpop.eup %2065 }
 0x5be   :  { %v755_v51 = vmul.f32 %v2064_v44, %v754_v49  ;;  %v761_v52 = vmul.f32 %v2066_v50, %v749_v45  ;;  %vm767_vm10 = vweird.f32 %v2066_v50 }
 0x5bf   :  { %vm768_vm12 = vmor %vm766_vm11, %vm767_vm10 }
 0x5c0   :  { %v762_v53 = vmul.f32 %v2066_v50, %v761_v52  ;;  %v759_v31 = vsel %vm758_vm9, %v2064_v44, %v755_v51 }
 0x5c1   :  { %v770_v57 = vmul.f32 %v759_v31, %v736_v26 }
 0x5c2   :  { %v763_v54 = vmul.f32 0.5, %v762_v53 }
 0x5c3   :  { %v775_v61 = vmul.f32 %v2013_v56, %v770_v57 }
 0x5c4   :  { %v764_v55 = vsub.f32 1.5, %v763_v54 }
 0x5c5   :  { %v780_v0 = vadd.f32 %v2014_v60, %v775_v61 }
 0x5c6   :  { %v765_v58 = vmul.f32 %v2066_v50, %v764_v55  ;;  %v2017_v55 = vld [vmem:[#allocation9] ss:$0 sm:$0xff] }
 0x5c8   :  { %v769_v59 = vsel %vm768_vm12, %v2066_v50, %v765_v58 }
 0x5c9   :  { %v771_v62 = vmul.f32 %v769_v59, %v737_v30  ;;  %v2018_v59 = vld [vmem:[%s2790_s12] ss:$0 sm:$0xff] }
 0x5cb   :  { %v776_v63 = vmul.f32 %v2013_v56, %v771_v62 }
 0x5cd   :  { %v781_v1 = vadd.f32 %v2014_v60, %v776_v63 }
 0x5cf   :  { %v782_v4 = vpack.c.bf16 %v781_v1, %v780_v0 }
 0x5d1   :  { %1872 = vmatmul.msk.bf16.vlgmr.msra.gmra.mxu2 %vm138_vm0, %v782_v4  ;;  %v2019_v4 = vld [vmem:[#allocation6 + $0x1] ss:$0 sm:$0xff] }
 0x654   :  { %v815_v9 = vpop.f32.mrf.mxu2 }
 0x655   :  { %v816_v11 = vadd.f32 %v2015_v10, %v815_v9 }
 0x657   :  { %v820_v14 = vmax.f32 %v816_v11, 0.0 }
 0x65c   :  { %v817_v12 = vpop.f32.mrf.mxu2 }
 0x65d   :  { %v818_v13 = vadd.f32 %v2015_v10, %v817_v12 }
 0x65f   :  { %v821_v15 = vmax.f32 %v818_v13, 0.0 }
 0x661   :  { %v822_v16 = vpack.c.bf16 %v821_v15, %v820_v14 }
 0x663   :  { %1889 = vmatmul.msk.bf16.vlgmr.msra.gmra.mxu3 %vm859_vm13, %v822_v16 }
 0x6e6   :  { %v872_v18 = vpop.f32.mrf.mxu3 }
 0x6e7   :  { %v873_v19 = vadd.f32 %v2016_v17, %v872_v18 }
 0x6e9   :  { %v877_v20 = vadd.f32 %v873_v19, %v780_v0 }
 0x6eb   :  { %v881_v21 = vsel %vm138_vm0, %v877_v20, 0.0 }
 0x6ec   :  { %882 = vadd.xlane.f32.xlu1 %v881_v21 }
 0x6ee   :  { %v874_v22 = vpop.f32.mrf.mxu3 }
 0x6ef   :  { %v875_v23 = vadd.f32 %v2016_v17, %v874_v22 }
 0x6f1   :  { %v878_v24 = vadd.f32 %v875_v23, %v781_v1 }
 0x6f3   :  { %v884_v25 = vsel %vm138_vm0, %v878_v24, 0.0 }
 0x6f4   :  { %885 = vadd.xlane.f32.xlu2 %v884_v25 }
 0x75f   :  { %v883_v41 = vpop.xlane.xlu1 %882 }
 0x760   :  { %v887_v2 = vmul.f32 %v883_v41, %v2499_v42 }
 0x762   :  { %v889_v43 = vsub.f32 %v877_v20, %v887_v2 }
 0x764   :  { %v891_v26 = vmul.f32 %v889_v43, %v889_v43 }
 0x766   :  { %v893_v27 = vsel %vm138_vm0, %v891_v26, 0.0 }
 0x767   :  { %v886_v3 = vpop.xlane.xlu2 %885  ;;  %894 = vadd.xlane.f32.xlu0 %v893_v27 }
 0x768   :  { %v888_v28 = vmul.f32 %v886_v3, %v2499_v42 }
 0x76a   :  { %v890_v29 = vsub.f32 %v878_v24, %v888_v28 }
 0x76c   :  { %v892_v30 = vmul.f32 %v890_v29, %v890_v29 }
 0x76e   :  { %v896_v32 = vsel %vm138_vm0, %v892_v30, 0.0 }
 0x76f   :  { %897 = vadd.xlane.f32.xlu1 %v896_v32 }
 0x7da   :  { %v895_v34 = vpop.xlane.xlu0 %894 }
 0x7db   :  { %v899_v35 = vmul.f32 %v895_v34, %v2499_v42 }
 0x7dd   :  { %v901_v36 = vadd.f32 1e-05, %v899_v35 }
 0x7df   :  { %2067 = vrsqrt.f32 %v901_v36  ;;  %vm909_vm15 = vweird.f32 %v901_v36 }
 0x7e2   :  { %v898_v38 = vpop.xlane.xlu1 %897 }
 0x7e3   :  { %v900_v39 = vmul.f32 %v898_v38, %v2499_v42 }
 0x7e5   :  { %v2068_v40 = vpop.eup %2067  ;;  %v902_v44 = vadd.f32 1e-05, %v900_v39 }
 0x7e6   :  { %v904_v45 = vmul.f32 %v2068_v40, %v901_v36  ;;  %vm910_vm14 = vweird.f32 %v2068_v40 }
 0x7e7   :  { %2069 = vrsqrt.f32 %v902_v44  ;;  %vm911_vm6 = vmor %vm909_vm15, %vm910_vm14  ;;  %vm919_vm8 = vweird.f32 %v902_v44 }
 0x7e8   :  { %v905_v46 = vmul.f32 %v2068_v40, %v904_v45 }
 0x7ea   :  { %v906_v47 = vmul.f32 0.5, %v905_v46 }
 0x7ec   :  { %v907_v48 = vsub.f32 1.5, %v906_v47 }
 0x7ed   :  { %v2070_v49 = vpop.eup %2069 }
 0x7ee   :  { %v908_v50 = vmul.f32 %v2068_v40, %v907_v48  ;;  %v914_v51 = vmul.f32 %v2070_v49, %v902_v44  ;;  %vm920_vm7 = vweird.f32 %v2070_v49 }
 0x7ef   :  { %vm921_vm9 = vmor %vm919_vm8, %vm920_vm7 }
 0x7f0   :  { %v915_v52 = vmul.f32 %v2070_v49, %v914_v51  ;;  %v912_v53 = vsel %vm911_vm6, %v2068_v40, %v908_v50 }
 0x7f1   :  { %v923_v56 = vmul.f32 %v912_v53, %v889_v43 }
 0x7f2   :  { %v916_v31 = vmul.f32 0.5, %v915_v52 }
 0x7f3   :  { %v928_v60 = vmul.f32 %v2017_v55, %v923_v56 }
 0x7f4   :  { %v917_v54 = vsub.f32 1.5, %v916_v31 }
 0x7f5   :  { %v2553_v63 = vadd.f32 %v2018_v59, %v928_v60 }
 0x7f6   :  { %v918_v57 = vmul.f32 %v2070_v49, %v917_v54 }
 0x7f8   :  { %v922_v58 = vsel %vm921_vm9, %v2070_v49, %v918_v57 }
 0x7f9   :  { %v924_v61 = vmul.f32 %v922_v58, %v890_v29 }
 0x7fb   :  { %v929_v62 = vmul.f32 %v2017_v55, %v924_v61 }
 0x7fd   :  { %v2555_v0 = vadd.f32 %v2018_v59, %v929_v62 }
 0x7ff   :  { %v935_v1 = vpack.c.bf16 %v2555_v0, %v2553_v63 }
 0x801   :  { %1902 = vmatmul.msk.bf16.vlgmr.msrb.gmra.mxu0 %vm138_vm0, %v935_v1 }
 0x87e   :  { %v970_v5 = vpop.f32.mrf.mxu0 }
 0x87f   :  { %v971_v6 = vadd.f32 %v2019_v4, %v970_v5 }
 0x881   :  { %977 = vrot.lane.b32.xlu2 %v971_v6, %s2252_s29  ;;  %v995_v10 = vpack.c.bf16 %v971_v6, %v971_v6 }
 0x883   :  { %v1004_v12 = vunpack.c.l.b16 %v995_v10 }
 0x885   :  { %v2568_v14 = vpack.c.b16 %v1004_v12, %v1004_v12 }
 0x886   :  { %v972_v7 = vpop.f32.mrf.mxu0 }
 0x887   :  { %v973_v8 = vadd.f32 %v2019_v4, %v972_v7 }
 0x889   :  { %985 = vrot.lane.b32.xlu1 %v973_v8, %s2251_s27  ;;  %979 = vrot.lane.b32.xlu0 %v973_v8, %s2252_s29  ;;  %v996_v9 = vpack.c.bf16 %v973_v8, %v973_v8 }
 0x88a   :  { %983 = vrot.lane.b32.xlu2 %v971_v6, %s2251_s27 }
 0x88b   :  { %v1028_v11 = vunpack.c.l.b16 %v996_v9 }
 0x88d   :  { %v2566_v13 = vpack.c.b16 %v1028_v11, %v1028_v11 }
 0x891   :  { %991 = vrot.lane.b32.xlu1 %v973_v8, %s2253_s16  ;;  %989 = vrot.lane.b32.xlu0 %v971_v6, %s2253_s16 }
 0x899   :  { %1030 = vrot.lane.b32.xlu0 %v2566_v13, %s2254_s17  ;;  %1006 = vrot.lane.b32.xlu1 %v2568_v14, %s2254_s17 }
 0x8db   :  { %v978_v15 = vpop.permute.xlu2 %977 }
 0x8dc   :  { %v997_v16 = vpack.c.bf16 %v978_v15, %v978_v15 }
 0x8de   :  { %v1052_v17 = vunpack.c.l.b16 %v997_v16 }
 0x8e0   :  { %v2574_v18 = vpack.c.b16 %v1052_v17, %v1052_v17 }
 0x8e2   :  { %1054 = vrot.lane.b32.xlu2 %v2574_v18, %s2254_s17 }
 0x8e4   :  { %v984_v23 = vpop.permute.xlu2 %983 }
 0x8e5   :  { %v999_v41 = vpack.c.bf16 %v984_v23, %v984_v23 }
 0x8e7   :  { %v1100_v3 = vunpack.c.l.b16 %v999_v41 }
 0x8e9   :  { %v2586_v33 = vpack.c.b16 %v1100_v3, %v1100_v3 }
 0x8fb   :  { %v986_v19 = vpop.permute.xlu1 %985  ;;  %v980_v20 = vpop.permute.xlu0 %979 }
 0x8fc   :  { %v1000_v21 = vpack.c.bf16 %v986_v19, %v986_v19  ;;  %v998_v22 = vpack.c.bf16 %v980_v20, %v980_v20 }
 0x8fe   :  { %v1124_v24 = vunpack.c.l.b16 %v1000_v21  ;;  %v1076_v25 = vunpack.c.l.b16 %v998_v22 }
 0x900   :  { %v2578_v2 = vpack.c.b16 %v1124_v24, %v1124_v24  ;;  %v2580_v43 = vpack.c.b16 %v1076_v25, %v1076_v25 }
 0x902   :  { %1078 = vrot.lane.b32.xlu0 %v2580_v43, %s2254_s17  ;;  %1126 = vrot.lane.b32.xlu2 %v2578_v2, %s2254_s17 }
 0x903   :  { %v992_v26 = vpop.permute.xlu1 %991  ;;  %v990_v27 = vpop.permute.xlu0 %989 }
 0x904   :  { %v1002_v28 = vpack.c.bf16 %v992_v26, %v992_v26  ;;  %v1001_v29 = vpack.c.bf16 %v990_v27, %v990_v27 }
 0x906   :  { %v1172_v30 = vunpack.c.l.b16 %v1002_v28  ;;  %v1148_v32 = vunpack.c.l.b16 %v1001_v29 }
 0x908   :  { %v2588_v34 = vpack.c.b16 %v1172_v30, %v1172_v30  ;;  %v2590_v35 = vpack.c.b16 %v1148_v32, %v1148_v32 }
 0x90a   :  { %1174 = vrot.lane.b32.xlu2 %v2588_v34, %s2254_s17  ;;  %1102 = vrot.lane.b32.xlu0 %v2586_v33, %s2254_s17 }
 0x90b   :  { %1150 = vrot.lane.b32.xlu1 %v2590_v35, %s2254_s17  ;;  %v1031_v36 = vpop.permute.xlu0 %1030  ;;  %v1007_v37 = vpop.permute.xlu1 %1006 }
 0x90c   :  { %v1036_v38 = vsel %vm189_vm1, %v1031_v36, 0  ;;  %v1012_v39 = vsel %vm189_vm1, %v1007_v37, 0 }
 0x90d   :  { %1021 = vmatpush.bf16.xpose.msrb.mxu1 %v1012_v39  ;;  %1045 = vmatpush.bf16.xpose.msrb.mxu2 %v1036_v38 }
 0x914   :  { %1903 = vmatmul.msk.bf16.vlgmr.msrb.gmra.mxu1 %vm189_vm1, %v995_v10  ;;  %1904 = vmatmul.msk.bf16.vlgmr.msrb.gmra.mxu2 %vm189_vm1, %v996_v9 }
 0x93c   :  { %v1055_v40 = vpop.permute.xlu2 %1054 }
 0x93d   :  { %v1060_v44 = vsel %vm189_vm1, %v1055_v40, 0 }
 0x93e   :  { %1069 = vmatpush.bf16.xpose.msrb.mxu3 %v1060_v44 }
 0x945   :  { %1905 = vmatmul.msk.bf16.vlgmr.msrb.gmra.mxu3 %vm189_vm1, %v997_v16 }
 0x95c   :  { %v1127_v45 = vpop.permute.xlu2 %1126 }
 0x95d   :  { %v1132_v46 = vsel %vm189_vm1, %v1127_v45, 0 }
 0x95e   :  { %1141 = vmatpush.bf16.xpose.msra.mxu2 %v1132_v46 }
 0x964   :  { %v1175_v47 = vpop.permute.xlu2 %1174 }
 0x965   :  { %1908 = vmatmul.msk.bf16.vlgmr.msra.gmra.mxu2 %vm189_vm1, %v1000_v21  ;;  %v1180_v50 = vsel %vm189_vm1, %v1175_v47, 0 }
 0x974   :  { %v1079_v48 = vpop.permute.xlu0 %1078 }
 0x975   :  { %v1084_v49 = vsel %vm189_vm1, %v1079_v48, 0 }
 0x976   :  { %1093 = vmatpush.bf16.xpose.msra.mxu0 %v1084_v49 }
 0x97c   :  { %v1103_v51 = vpop.permute.xlu0 %1102 }
 0x97d   :  { %v1108_v52 = vsel %vm189_vm1, %v1103_v51, 0  ;;  %v1151_v53 = vpop.permute.xlu1 %1150  ;;  %1906 = vmatmul.msk.bf16.vlgmr.msra.gmra.mxu0 %vm189_vm1, %v998_v22 }
 0x97e   :  { %1189 = vmatpush.bf16.xpose.msrb.mxu0 %v1180_v50  ;;  %v1156_v31 = vsel %vm189_vm1, %v1151_v53, 0  ;;  %1117 = vmatpush.bf16.xpose.msra.mxu1 %v1108_v52 }
 0x97f   :  { %1165 = vmatpush.bf16.xpose.msra.mxu3 %v1156_v31 }
 0x985   :  { %1907 = vmatmul.msk.bf16.vlgmr.msra.gmra.mxu1 %vm189_vm1, %v999_v41 }
 0x986   :  { %1909 = vmatmul.msk.bf16.vlgmr.msra.gmra.mxu3 %vm189_vm1, %v1001_v29 }
 0x98d   :  { %1910 = vmatmul.msk.bf16.vlgmr.msrb.gmra.mxu0 %vm189_vm1, %v1002_v28 }
 0x991   :  { %v1023_v54 = vpop.f32.mrf.mxu1 }
 0x992   :  { %v1195_v55 = vsel %vm189_vm1, %v1023_v54, -inf }
 0x993   :  { %1196 = vmax.xlane.f32.xlu2 %v1195_v55 }
 0x997   :  { %v1047_v56 = vpop.f32.mrf.mxu2 }
 0x998   :  { %v1198_v57 = vsel %vm189_vm1, %v1047_v56, -inf }
 0x999   :  { %1199 = vmax.xlane.f32.xlu1 %v1198_v57  ;;  %v1025_v58 = vpop.f32.mrf.mxu1 }
 0x99f   :  { %v1049_v59 = vpop.f32.mrf.mxu2 }
 0x9ab   :  { %1291 = vrot.lane.b32.xlu2 %v2568_v14, %s2255_s18 }
 0x9c8   :  { %v1071_v60 = vpop.f32.mrf.mxu3 }
 0x9c9   :  { %v1201_v61 = vsel %vm189_vm1, %v1071_v60, -inf }
 0x9ca   :  { %1202 = vmax.xlane.f32.xlu0 %v1201_v61 }
 0x9d0   :  { %v1073_v62 = vpop.f32.mrf.mxu3 }
 0x9de   :  { %1333 = vrot.lane.b32.xlu0 %v2574_v18, %s2255_s18 }
 0x9e8   :  { %v2621_v1 = vpop.f32.mrf.mxu2 }
 0x9e9   :  { %v1210_v3 = vsel %vm189_vm1, %v2621_v1, -inf }
 0x9f0   :  { %v1145_v4 = vpop.f32.mrf.mxu2 }
 0x9fa   :  { %v1095_v5 = vpop.f32.mrf.mxu0 }
 0x9fb   :  { %v1204_v17 = vsel %vm189_vm1, %v1095_v5, -inf }
 0xa02   :  { %v1097_v6 = vpop.f32.mrf.mxu0  ;;  %v1119_v7 = vpop.f32.mrf.mxu1 }
 0xa03   :  { %v1207_v8 = vsel %vm189_vm1, %v1119_v7, -inf }
 0xa04   :  { %1208 = vmax.xlane.f32.xlu1 %v1207_v8 }
 0xa06   :  { %v1197_v9 = vpop.xlane.xlu2 %1196 }
 0xa07   :  { %v1219_v10 = vsub.f32 %v1023_v54, %v1197_v9 }
 0xa09   :  { %v1227_v11 = vmul.f32 1.442695, %v1219_v10  ;;  %v1167_v12 = vpop.f32.mrf.mxu3 }
 0xa0a   :  { %v1121_v14 = vpop.f32.mrf.mxu1  ;;  %v2624_v15 = vpop.f32.mrf.mxu0  ;;  %v1213_v16 = vsel %vm189_vm1, %v1167_v12, -inf }
 0xa0b   :  { %2071 = vpow2.f32 %v1227_v11  ;;  %1214 = vmax.xlane.f32.xlu2 %v1213_v16  ;;  %v1216_v28 = vsel %vm189_vm1, %v2624_v15, -inf }
 0xa0c   :  { %1205 = vmax.xlane.f32.xlu1 %v1204_v17  ;;  %v1200_v18 = vpop.xlane.xlu1 %1199 }
 0xa0d   :  { %v1220_v19 = vsub.f32 %v1047_v56, %v1200_v18 }
 0xa0e   :  { %v1292_v20 = vpop.permute.xlu2 %1291 }
 0xa0f   :  { %v1229_v21 = vmul.f32 1.442695, %v1220_v19  ;;  %v1297_v22 = vsel %vm478_vm2, %v1292_v20, 0 }
 0xa10   :  { %1306 = vmatpush.bf16.msrb.mxu1 %v1297_v22 }
 0xa11   :  { %v2072_v23 = vpop.eup %2071  ;;  %2073 = vpow2.f32 %v1229_v21  ;;  %v1169_v24 = vpop.f32.mrf.mxu3 }
 0xa12   :  { %v1193_v25 = vpop.f32.mrf.mxu0  ;;  %v1243_v41 = vsel %vm189_vm1, %v2072_v23, 0.0 }
 0xa13   :  { %1244 = vadd.xlane.f32.xlu0 %v1243_v41 }
 0xa17   :  { %v2074_v26 = vpop.eup %2073 }
 0xa18   :  { %v1246_v27 = vsel %vm189_vm1, %v2074_v26, 0.0 }
 0xa19   :  { %1247 = vadd.xlane.f32.xlu2 %v1246_v27 }
 0xa1b   :  { %1211 = vmax.xlane.f32.xlu0 %v1210_v3 }
 0xa23   :  { %1217 = vmax.xlane.f32.xlu0 %v1216_v28 }
 0xa25   :  { %1312 = vrot.lane.b32.xlu1 %v2566_v13, %s2255_s18 }
 0xa37   :  { %1354 = vrot.lane.b32.xlu0 %v2580_v43, %s2255_s18 }
 0xa3d   :  { %v1203_v29 = vpop.xlane.xlu0 %1202 }
 0xa3e   :  { %v1221_v30 = vsub.f32 %v1071_v60, %v1203_v29 }
 0xa40   :  { %v1231_v32 = vmul.f32 1.442695, %v1221_v30 }
 0xa42   :  { %2075 = vpow2.f32 %v1231_v32 }
 0xa48   :  { %v2639_v36 = vpop.eup %2075 }
 0xa49   :  { %v1249_v37 = vsel %vm189_vm1, %v2639_v36, 0.0 }
 0xa4f   :  { %1250 = vadd.xlane.f32.xlu1 %v1249_v37 }
 0xa50   :  { %v1334_v38 = vpop.permute.xlu0 %1333 }
 0xa51   :  { %v1339_v39 = vsel %vm478_vm2, %v1334_v38, 0 }
 0xa52   :  { %1348 = vmatpush.bf16.msrb.mxu3 %v1339_v39 }
 0xa77   :  { %v1209_v40 = vpop.xlane.xlu1 %1208 }
 0xa78   :  { %v1223_v44 = vsub.f32 %v1119_v7, %v1209_v40 }
 0xa7a   :  { %v1235_v13 = vmul.f32 1.442695, %v1223_v44 }
 0xa7c   :  { %2077 = vpow2.f32 %v1235_v13 }
 0xa7e   :  { %v1215_v45 = vpop.xlane.xlu2 %1214 }
 0xa7f   :  { %v1206_v43 = vpop.xlane.xlu1 %1205  ;;  %v1225_v48 = vsub.f32 %v1167_v12, %v1215_v45 }
 0xa80   :  { %v1222_v46 = vsub.f32 %v1095_v5, %v1206_v43 }
 0xa81   :  { %v1239_v51 = vmul.f32 1.442695, %v1225_v48 }
 0xa82   :  { %v2644_v47 = vpop.eup %2077  ;;  %v1233_v49 = vmul.f32 1.442695, %v1222_v46 }
 0xa83   :  { %v1255_v50 = vsel %vm189_vm1, %v2644_v47, 0.0 }
 0xa84   :  { %2079 = vpow2.f32 %v1233_v49  ;;  %1256 = vadd.xlane.f32.xlu0 %v1255_v50 }
 0xa86   :  { %v1245_v52 = vpop.xlane.xlu0 %1244 }
 0xa87   :  { %2081 = vrcp.f32 %v1245_v52 }
 0xa88   :  { %2083 = vpow2.f32 %v1239_v51 }
 0xa8a   :  { %v2080_v53 = vpop.eup %2079 }
 0xa8b   :  { %v1252_v31 = vsel %vm189_vm1, %v2080_v53, 0.0 }
 0xa8c   :  { %v1248_v54 = vpop.xlane.xlu2 %1247  ;;  %1253 = vadd.xlane.f32.xlu2 %v1252_v31 }
 0xa8d   :  { %v2082_v55 = vpop.eup %2081  ;;  %2085 = vrcp.f32 %v1248_v54 }
 0xa8e   :  { %v1275_v56 = vmul.f32 %v2082_v55, %v2072_v23  ;;  %v1212_v57 = vpop.xlane.xlu0 %1211  ;;  %v2084_v59 = vpop.eup %2083 }
 0xa8f   :  { %v1224_v58 = vsub.f32 %v2621_v1, %v1212_v57  ;;  %v1261_v4 = vsel %vm189_vm1, %v2084_v59, 0.0 }
 0xa90   :  { %v1283_v60 = vpack.c.bf16 %v1275_v56, %v1275_v56 }
 0xa91   :  { %v1237_v61 = vmul.f32 1.442695, %v1224_v58 }
 0xa92   :  { %1911 = vmatmul.msk.bf16.vlgmr.msrb.gmra.mxu1 %vm189_vm1, %v1283_v60 }
 0xa93   :  { %v2086_v62 = vpop.eup %2085  ;;  %2087 = vpow2.f32 %v1237_v61 }
 0xa94   :  { %1262 = vadd.xlane.f32.xlu2 %v1261_v4  ;;  %v1276_v5 = vmul.f32 %v2086_v62, %v2074_v26 }
 0xa96   :  { %v1218_v6 = vpop.xlane.xlu0 %1217  ;;  %v1284_v11 = vpack.c.bf16 %v1276_v5, %v1276_v5 }
 0xa97   :  { %v1226_v7 = vsub.f32 %v2624_v15, %v1218_v6  ;;  %v1313_v8 = vpop.permute.xlu1 %1312 }
 0xa98   :  { %v1318_v9 = vsel %vm478_vm2, %v1313_v8, 0  ;;  %1417 = vrot.lane.b32.xlu0 %v2590_v35, %s2255_s18  ;;  %v1987_v8 = vld [vmem:[%s2781_s3 + $0x10] sm:$0xff] }
 0xa99   :  { %v2656_v1 = vpop.eup %2087  ;;  %v1241_v10 = vmul.f32 1.442695, %v1226_v7  ;;  %1327 = vmatpush.bf16.msrb.mxu2 %v1318_v9  ;;  %v1988_v7 = vld [vmem:[%s2781_s3 + $0x18] sm:$0xff] }
 0xa9a   :  { %v1258_v12 = vsel %vm189_vm1, %v2656_v1, 0.0 }
 0xa9b   :  { %2089 = vpow2.f32 %v1241_v10  ;;  %1259 = vadd.xlane.f32.xlu1 %v1258_v12 }
 0xa9c   :  { %1912 = vmatmul.msk.bf16.vlgmr.msrb.gmra.mxu2 %vm189_vm1, %v1284_v11 }
 0xaa0   :  { %1438 = vrot.lane.b32.xlu0 %v2588_v34, %s2255_s18 }
 0xaa1   :  { %v2090_v14 = vpop.eup %2089 }
 0xaa2   :  { %v1264_v15 = vsel %vm189_vm1, %v2090_v14, 0.0 }
 0xaa3   :  { %1265 = vadd.xlane.f32.xlu2 %v1264_v15 }
 0xaa9   :  { %v1355_v35 = vpop.permute.xlu0 %1354 }
 0xaaa   :  { %v1360_v16 = vsel %vm478_vm2, %v1355_v35, 0  ;;  %v2020_v35 = vld [vmem:[%s2782_s4 + $0x1] ss:$0 sm:$0xff] }
 0xaab   :  { %1369 = vmatpush.bf16.msra.mxu0 %v1360_v16 }
 0xab4   :  { %1396 = vrot.lane.b32.xlu1 %v2578_v2, %s2255_s18 }
 0xabb   :  { %1375 = vrot.lane.b32.xlu2 %v2586_v33, %s2255_s18  ;;  %s1815_s18 = sshll.u32 %s2793_s15, 4  ;;  %s1816_s18 = int_to_ptr.hbm [resolvable:$true] %s1815_s18 }
 0xac2   :  { %v1251_v17 = vpop.xlane.xlu1 %1250 }
 0xac3   :  { %2091 = vrcp.f32 %v1251_v17 }
 0xac9   :  { %v2092_v18 = vpop.eup %2091 }
 0xaca   :  { %v1277_v19 = vmul.f32 %v2092_v18, %v2639_v36 }
 0xacc   :  { %v1285_v34 = vpack.c.bf16 %v1277_v19, %v1277_v19 }
 0xace   :  { %1913 = vmatmul.msk.bf16.vlgmr.msrb.gmra.mxu3 %vm189_vm1, %v1285_v34 }
 0xaf7   :  { %v1257_v21 = vpop.xlane.xlu0 %1256 }
 0xaff   :  { %v1254_v20 = vpop.xlane.xlu2 %1253 }
 0xb00   :  { %2093 = vrcp.f32 %v1254_v20 }
 0xb06   :  { %v2094_v22 = vpop.eup %2093 }
 0xb07   :  { %v1278_v23 = vmul.f32 %v2094_v22, %v2080_v53  ;;  %v1263_v24 = vpop.xlane.xlu2 %1262 }
 0xb08   :  { %2095 = vrcp.f32 %v1263_v24 }
 0xb09   :  { %v1286_v25 = vpack.c.bf16 %v1278_v23, %v1278_v23  ;;  %2097 = vrcp.f32 %v1257_v21 }
 0xb0a   :  { %v1418_v2 = vpop.permute.xlu0 %1417 }
 0xb0b   :  { %v1423_v41 = vsel %vm478_vm2, %v1418_v2, 0  ;;  %1914 = vmatmul.msk.bf16.vlgmr.msra.gmra.mxu0 %vm189_vm1, %v1286_v25 }
 0xb0c   :  { %1432 = vmatpush.bf16.msra.mxu3 %v1423_v41 }
 0xb0e   :  { %v2096_v33 = vpop.eup %2095  ;;  %v1260_v36 = vpop.xlane.xlu1 %1259 }
 0xb0f   :  { %v1281_v26 = vmul.f32 %v2096_v33, %v2084_v59  ;;  %v1308_v27 = vpop.f32.mrf.mxu1  ;;  %v2098_v37 = vpop.eup %2097 }
 0xb10   :  { %1459 = vst.msk [vmem:[#allocation2] sm:$0xff] %vm189_vm1, %v1308_v27  ;;  %v1279_v39 = vmul.f32 %v2098_v37, %v2644_v47 }
 0xb11   :  { %v1289_v3 = vpack.c.bf16 %v1281_v26, %v1281_v26 }
 0xb12   :  { %v1439_v28 = vpop.permute.xlu0 %1438  ;;  %v1287_v46 = vpack.c.bf16 %v1279_v39, %v1279_v39 }
 0xb13   :  { %v1444_v29 = vsel %vm478_vm2, %v1439_v28, 0  ;;  %1917 = vmatmul.msk.bf16.vlgmr.msra.gmra.mxu3 %vm189_vm1, %v1289_v3 }
 0xb14   :  { %1453 = vmatpush.bf16.msrb.mxu0 %v1444_v29 }
 0xb16   :  { %v1266_v30 = vpop.xlane.xlu2 %1265 }
 0xb17   :  { %2099 = vrcp.f32 %v1266_v30  ;;  %v1310_v32 = vpop.f32.mrf.mxu1 }
 0xb18   :  { %2101 = vrcp.f32 %v1260_v36  ;;  %v1989_v32 = vld [vmem:[%s2785_s7 + $0x10] sm:$0xff] }
 0xb1d   :  { %v2100_v38 = vpop.eup %2099 }
 0xb1e   :  { %v1282_v40 = vmul.f32 %v2100_v38, %v2090_v14  ;;  %v1376_v44 = vpop.permute.xlu2 %1375  ;;  %v2102_v48 = vpop.eup %2101 }
 0xb1f   :  { %v1381_v13 = vsel %vm478_vm2, %v1376_v44, 0  ;;  %v1329_v45 = vpop.f32.mrf.mxu2  ;;  %v1280_v49 = vmul.f32 %v2102_v48, %v2656_v1 }
 0xb20   :  { %v1290_v43 = vpack.c.bf16 %v1282_v40, %v1282_v40  ;;  %1460 = vst.msk [vmem:[#allocation2 + $0x8] sm:$0xff] %vm189_vm1, %v1329_v45  ;;  %1390 = vmatpush.bf16.msra.mxu1 %v1381_v13 }
 0xb21   :  { %v1288_v52 = vpack.c.bf16 %v1280_v49, %v1280_v49 }
 0xb22   :  { %1918 = vmatmul.msk.bf16.vlgmr.msrb.gmra.mxu0 %vm189_vm1, %v1290_v43 }
 0xb23   :  { %1915 = vmatmul.msk.bf16.vlgmr.msra.gmra.mxu1 %vm189_vm1, %v1287_v46 }
 0xb24   :  { %1525 = vmatpush.bf16.msrb.mxu1 %v1988_v7 }
 0xb26   :  { %v1397_v50 = vpop.permute.xlu1 %1396 }
 0xb27   :  { %v1402_v47 = vsel %vm478_vm2, %v1397_v50, 0  ;;  %v1331_v51 = vpop.f32.mrf.mxu2 }
 0xb28   :  { %1411 = vmatpush.bf16.msra.mxu2 %v1402_v47  ;;  %1526 = vmatpush.bf16.msrb.mxu1 %v1987_v8  ;;  %v2023_v8 = vld [vmem:[%s2786_s8 + $0x1] ss:$0 sm:$0xff] }
 0xb2b   :  { %1916 = vmatmul.msk.bf16.vlgmr.msra.gmra.mxu2 %vm189_vm1, %v1288_v52  ;;  %v2021_v52 = vld [vmem:[#allocation8 + $0x1] ss:$0 sm:$0xff] }
 0xb51   :  { %v1350_v53 = vpop.f32.mrf.mxu3 }
 0xb52   :  { %1463 = vrot.lane.b32.xlu1 %v1350_v53, %s2248_s2 }
 0xb59   :  { %v1352_v31 = vpop.f32.mrf.mxu3 }
 0xb88   :  { %v1371_v54 = vpop.f32.mrf.mxu0 }
 0xb89   :  { %1465 = vrot.lane.b32.xlu2 %v1371_v54, %s2248_s2 }
 0xb90   :  { %v1373_v55 = vpop.f32.mrf.mxu0 }
 0xb91   :  { %v2022_v55 = vld [vmem:[%s2784_s6 + $0x1] ss:$0 sm:$0xff] }
 0xb96   :  { %v1434_v56 = vpop.f32.mrf.mxu3 }
 0xb97   :  { %1483 = vrot.lane.b32.xlu2 %v1434_v56, %s2256_s0 }
 0xb9e   :  { %v1436_v57 = vpop.f32.mrf.mxu3 }
 0xb9f   :  { %v1455_v58 = vpop.f32.mrf.mxu0 }
 0xba0   :  { %v1392_v59 = vpop.f32.mrf.mxu1 }
 0xba1   :  { %1473 = vrot.lane.b32.xlu0 %v1392_v59, %s2244_s26 }
 0xba7   :  { %v1457_v60 = vpop.f32.mrf.mxu0 }
 0xba8   :  { %v1394_v61 = vpop.f32.mrf.mxu1 }
 0xba9   :  { %1485 = vrot.lane.b32.xlu0 %v1455_v58, %s2256_s0 }
 0xbae   :  { %v1413_v62 = vpop.f32.mrf.mxu2 }
 0xbaf   :  { %1475 = vrot.lane.b32.xlu1 %v1413_v62, %s2244_s26  ;;  %v1994_v62 = vld [vmem:[%s2787_s9 + $0x38] sm:$0xff] }
 0xbb0   :  { %1681 = vmatpush.bf16.msrb.mxu3 %v1994_v62 }
 0xbb6   :  { %v1415_v4 = vpop.f32.mrf.mxu2 }
 0xbb7   :  { %v1993_v4 = vld [vmem:[%s2787_s9 + $0x30] sm:$0xff] }
 0xbb8   :  { %1682 = vmatpush.bf16.msrb.mxu3 %v1993_v4 }
 0xbc4   :  { %v1464_v5 = vpop.permute.xlu1 %1463 }
 0xbc5   :  { %1469 = vst.msk [vmem:[#allocation2] sm:$0xff] %vm652_vm3, %v1464_v5  ;;  %v1992_v5 = vld [vmem:[%s2787_s9 + $0x28] sm:$0xff] }
 0xbc6   :  { %1683 = vmatpush.bf16.msrb.mxu3 %v1992_v5 }
 0xbe3   :  { %v1466_v6 = vpop.permute.xlu2 %1465 }
 0xbe4   :  { %1470 = vst.msk [vmem:[#allocation2 + $0x8] sm:$0xff] %vm652_vm3, %v1466_v6  ;;  %v1991_v6 = vld [vmem:[%s2787_s9 + $0x20] sm:$0xff] }
 0xbe5   :  { %1684 = vmatpush.bf16.msrb.mxu3 %v1991_v6 }
 0xbf1   :  { %v1484_v1 = vpop.permute.xlu2 %1483 }
 0xc13   :  { %v1474_v9 = vpop.permute.xlu0 %1473 }
 0xc14   :  { %1479 = vst.msk [vmem:[#allocation2] sm:$0xff] %vm663_vm4, %v1474_v9 }
 0xc15   :  { %1489 = vst.msk [vmem:[#allocation2] sm:$0xff] %vm674_vm5, %v1484_v1 }
 0xc1b   :  { %v1486_v11 = vpop.permute.xlu0 %1485 }
 0xc1c   :  { %v1491_v12 = vld [vmem:[#allocation2] sm:$0xff] }
 0xc21   :  { %v1476_v10 = vpop.permute.xlu1 %1475 }
 0xc22   :  { %1480 = vst.msk [vmem:[#allocation2 + $0x8] sm:$0xff] %vm663_vm4, %v1476_v10 }
 0xc23   :  { %1490 = vst.msk [vmem:[#allocation2 + $0x8] sm:$0xff] %vm674_vm5, %v1486_v11 }
 0xc2a   :  { %v1492_v14 = vld [vmem:[#allocation2 + $0x8] sm:$0xff] }
 0xc2b   :  { %v1493_v15 = vpack.c.bf16 %v1492_v14, %v1491_v12 }
 0xc2d   :  { %1932 = vmatmul.msk.bf16.vlgmr.msrb.gmra.mxu1 %vm138_vm0, %v1493_v15  ;;  %v2024_v15 = vld [vmem:[%s2788_s10 + $0x1] ss:$0 sm:$0xff] }
 0xcaa   :  { %v1528_v16 = vpop.f32.mrf.mxu1 }
 0xcab   :  { %v1529_v17 = vadd.f32 %v2020_v35, %v1528_v16 }
 0xcad   :  { %v1533_v18 = vadd.f32 %v1529_v17, %v2553_v63 }
 0xcaf   :  { %v1539_v19 = vsel %vm138_vm0, %v1533_v18, 0.0 }
 0xcb0   :  { %1540 = vadd.xlane.f32.xlu1 %v1539_v19 }
 0xcb2   :  { %v1530_v34 = vpop.f32.mrf.mxu1 }
 0xcb3   :  { %v1531_v20 = vadd.f32 %v2020_v35, %v1530_v34 }
 0xcb5   :  { %v1534_v21 = vadd.f32 %v1531_v20, %v2555_v0  ;;  %v1990_v0 = vld [vmem:[%s2785_s7 + $0x18] sm:$0xff] }
 0xcb6   :  { %1625 = vmatpush.bf16.msrb.mxu2 %v1990_v0 }
 0xcb7   :  { %v1542_v22 = vsel %vm138_vm0, %v1534_v21, 0.0 }
 0xcb8   :  { %1543 = vadd.xlane.f32.xlu2 %v1542_v22 }
 0xcba   :  { %1626 = vmatpush.bf16.msrb.mxu2 %v1989_v32 }
 0xd23   :  { %v1541_v23 = vpop.xlane.xlu1 %1540 }
 0xd24   :  { %v1545_v24 = vmul.f32 %v1541_v23, %v2499_v42 }
 0xd26   :  { %v1547_v25 = vsub.f32 %v1533_v18, %v1545_v24 }
 0xd28   :  { %v1549_v2 = vmul.f32 %v1547_v25, %v1547_v25 }
 0xd2a   :  { %v1551_v41 = vsel %vm138_vm0, %v1549_v2, 0.0 }
 0xd2b   :  { %v1544_v33 = vpop.xlane.xlu2 %1543  ;;  %1552 = vadd.xlane.f32.xlu0 %v1551_v41 }
 0xd2c   :  { %v1546_v63 = vmul.f32 %v1544_v33, %v2499_v42 }
 0xd2e   :  { %v1548_v26 = vsub.f32 %v1534_v21, %v1546_v63 }
 0xd30   :  { %v1550_v27 = vmul.f32 %v1548_v26, %v1548_v26 }
 0xd32   :  { %v1554_v3 = vsel %vm138_vm0, %v1550_v27, 0.0 }
 0xd33   :  { %1555 = vadd.xlane.f32.xlu1 %v1554_v3 }
 0xd9e   :  { %v1553_v28 = vpop.xlane.xlu0 %1552 }
 0xd9f   :  { %v1557_v29 = vmul.f32 %v1553_v28, %v2499_v42 }
 0xda1   :  { %v1559_v30 = vadd.f32 1e-05, %v1557_v29 }
 0xda3   :  { %2103 = vrsqrt.f32 %v1559_v30  ;;  %vm1567_vm2 = vweird.f32 %v1559_v30 }
 0xda6   :  { %v1556_v36 = vpop.xlane.xlu1 %1555 }
 0xda7   :  { %v1558_v37 = vmul.f32 %v1556_v36, %v2499_v42 }
 0xda9   :  { %v2104_v38 = vpop.eup %2103  ;;  %v1560_v39 = vadd.f32 1e-05, %v1558_v37 }
 0xdaa   :  { %v1562_v40 = vmul.f32 %v2104_v38, %v1559_v30  ;;  %vm1568_vm1 = vweird.f32 %v2104_v38 }
 0xdab   :  { %2105 = vrsqrt.f32 %v1560_v39  ;;  %vm1569_vm3 = vmor %vm1567_vm2, %vm1568_vm1  ;;  %vm1577_vm5 = vweird.f32 %v1560_v39 }
 0xdac   :  { %v1563_v44 = vmul.f32 %v2104_v38, %v1562_v40 }
 0xdae   :  { %v1564_v13 = vmul.f32 0.5, %v1563_v44 }
 0xdb0   :  { %v1565_v45 = vsub.f32 1.5, %v1564_v13 }
 0xdb1   :  { %v2106_v43 = vpop.eup %2105 }
 0xdb2   :  { %v1566_v46 = vmul.f32 %v2104_v38, %v1565_v45  ;;  %v1572_v48 = vmul.f32 %v2106_v43, %v1560_v39  ;;  %vm1578_vm4 = vweird.f32 %v2106_v43 }
 0xdb3   :  { %vm1579_vm10 = vmor %vm1577_vm5, %vm1578_vm4 }
 0xdb4   :  { %v1573_v49 = vmul.f32 %v2106_v43, %v1572_v48  ;;  %v1570_v50 = vsel %vm1569_vm3, %v2104_v38, %v1566_v46 }
 0xdb5   :  { %v1581_v53 = vmul.f32 %v1570_v50, %v1547_v25  ;;  %v2026_v50 = vld [vmem:[%s2790_s12 + $0x1] ss:$0 sm:$0xff] }
 0xdb6   :  { %v1574_v47 = vmul.f32 0.5, %v1573_v49 }
 0xdb7   :  { %v1586_v56 = vmul.f32 %v2021_v52, %v1581_v53 }
 0xdb8   :  { %v1575_v51 = vsub.f32 1.5, %v1574_v47 }
 0xdb9   :  { %v1591_v59 = vadd.f32 %v2022_v55, %v1586_v56 }
 0xdba   :  { %v1576_v31 = vmul.f32 %v2106_v43, %v1575_v51 }
 0xdbc   :  { %v1580_v54 = vsel %vm1579_vm10, %v2106_v43, %v1576_v31  ;;  %v2025_v43 = vld [vmem:[#allocation9 + $0x1] ss:$0 sm:$0xff] }
 0xdbd   :  { %v1582_v57 = vmul.f32 %v1580_v54, %v1548_v26 }
 0xdbf   :  { %v1587_v58 = vmul.f32 %v2021_v52, %v1582_v57 }
 0xdc1   :  { %v1592_v60 = vadd.f32 %v2022_v55, %v1587_v58 }
 0xdc3   :  { %v1593_v61 = vpack.c.bf16 %v1592_v60, %v1591_v59 }
 0xdc5   :  { %1947 = vmatmul.msk.bf16.vlgmr.msrb.gmra.mxu2 %vm138_vm0, %v1593_v61 }
 0xe48   :  { %v1628_v7 = vpop.f32.mrf.mxu2 }
 0xe49   :  { %v1629_v9 = vadd.f32 %v2023_v8, %v1628_v7 }
 0xe4b   :  { %v1633_v11 = vmax.f32 %v1629_v9, 0.0 }
 0xe50   :  { %v1630_v1 = vpop.f32.mrf.mxu2 }
 0xe51   :  { %v1631_v10 = vadd.f32 %v2023_v8, %v1630_v1 }
 0xe53   :  { %v1634_v12 = vmax.f32 %v1631_v10, 0.0 }
 0xe55   :  { %v1635_v14 = vpack.c.bf16 %v1634_v12, %v1633_v11 }
 0xe57   :  { %1973 = vmatmul.msk.bf16.vlgmr.msrb.gmra.mxu3 %vm859_vm13, %v1635_v14 }
 0xeda   :  { %v1686_v35 = vpop.f32.mrf.mxu3 }
 0xedb   :  { %v1687_v16 = vadd.f32 %v2024_v15, %v1686_v35 }
 0xedd   :  { %v1691_v17 = vadd.f32 %v1687_v16, %v1591_v59 }
 0xedf   :  { %v1697_v18 = vsel %vm138_vm0, %v1691_v17, 0.0 }
 0xee0   :  { %1698 = vadd.xlane.f32.xlu2 %v1697_v18 }
 0xee2   :  { %v1688_v19 = vpop.f32.mrf.mxu3 }
 0xee3   :  { %v1689_v34 = vadd.f32 %v2024_v15, %v1688_v19 }
 0xee5   :  { %v1692_v20 = vadd.f32 %v1689_v34, %v1592_v60 }
 0xee7   :  { %v1700_v21 = vsel %vm138_vm0, %v1692_v20, 0.0 }
 0xee8   :  { %1701 = vadd.xlane.f32.xlu0 %v1700_v21 }
 0xf53   :  { %v1699_v22 = vpop.xlane.xlu2 %1698 }
 0xf54   :  { %v1703_v23 = vmul.f32 %v1699_v22, %v2499_v42 }
 0xf56   :  { %v1705_v24 = vsub.f32 %v1691_v17, %v1703_v23  ;;  %v2027_v23 = vld [vmem:[%s2791_s13] ss:$0 sm:$0xff]  ;;  %s2258_s13 = smov [#allocation11]  }
 0xf57   :  { %s1813_s26 = sshll.u32 %s2258_s13, 4  ;;  %s1814_s26 = int_to_ptr.vmem [resolvable:$true] %s1813_s26 }
 0xf58   :  { %v1707_v25 = vmul.f32 %v1705_v24, %v1705_v24 }
 0xf5a   :  { %v1709_v2 = vsel %vm138_vm0, %v1707_v25, 0.0 }
 0xf5b   :  { %v1702_v41 = vpop.xlane.xlu0 %1701  ;;  %1710 = vadd.xlane.f32.xlu1 %v1709_v2  ;;  %v2028_v2 = vld [vmem:[%s2792_s14] ss:$0 sm:$0xff] }
 0xf5c   :  { %v1704_v33 = vmul.f32 %v1702_v41, %v2499_v42 }
 0xf5e   :  { %v1706_v63 = vsub.f32 %v1692_v20, %v1704_v33 }
 0xf60   :  { %v1708_v26 = vmul.f32 %v1706_v63, %v1706_v63 }
 0xf62   :  { %v1712_v27 = vsel %vm138_vm0, %v1708_v26, 0.0 }
 0xf63   :  { %1713 = vadd.xlane.f32.xlu2 %v1712_v27 }
 0xfce   :  { %v1711_v3 = vpop.xlane.xlu1 %1710 }
 0xfcf   :  { %v1715_v0 = vmul.f32 %v1711_v3, %v2499_v42 }
 0xfd1   :  { %v1717_v28 = vadd.f32 1e-05, %v1715_v0 }
 0xfd3   :  { %2107 = vrsqrt.f32 %v1717_v28  ;;  %vm1725_vm12 = vweird.f32 %v1717_v28 }
 0xfd6   :  { %v1714_v29 = vpop.xlane.xlu2 %1713 }
 0xfd7   :  { %v1716_v30 = vmul.f32 %v1714_v29, %v2499_v42 }
 0xfd9   :  { %v2108_v32 = vpop.eup %2107  ;;  %v1718_v36 = vadd.f32 1e-05, %v1716_v30 }
 0xfda   :  { %v1720_v37 = vmul.f32 %v2108_v32, %v1717_v28  ;;  %vm1726_vm11 = vweird.f32 %v2108_v32 }
 0xfdb   :  { %2109 = vrsqrt.f32 %v1718_v36  ;;  %vm1727_vm13 = vmor %vm1725_vm12, %vm1726_vm11  ;;  %vm1735_vm15 = vweird.f32 %v1718_v36 }
 0xfdc   :  { %v1721_v38 = vmul.f32 %v2108_v32, %v1720_v37 }
 0xfde   :  { %v1722_v39 = vmul.f32 0.5, %v1721_v38 }
 0xfe0   :  { %v1723_v40 = vsub.f32 1.5, %v1722_v39 }
 0xfe1   :  { %v2110_v44 = vpop.eup %2109 }
 0xfe2   :  { %v1724_v13 = vmul.f32 %v2108_v32, %v1723_v40  ;;  %v1730_v45 = vmul.f32 %v2110_v44, %v1718_v36  ;;  %vm1736_vm14 = vweird.f32 %v2110_v44 }
 0xfe3   :  { %vm1737_vm6 = vmor %vm1735_vm15, %vm1736_vm14 }
 0xfe4   :  { %v1731_v46 = vmul.f32 %v2110_v44, %v1730_v45  ;;  %v1728_v48 = vsel %vm1727_vm13, %v2108_v32, %v1724_v13 }
 0xfe5   :  { %v1739_v49 = vmul.f32 %v1728_v48, %v1705_v24 }
 0xfe6   :  { %v1732_v47 = vmul.f32 0.5, %v1731_v46 }
 0xfe7   :  { %v1744_v51 = vmul.f32 %v2025_v43, %v1739_v49 }
 0xfe8   :  { %v1733_v52 = vsub.f32 1.5, %v1732_v47 }
 0xfe9   :  { %v1749_v53 = vadd.f32 %v2026_v50, %v1744_v51 }
 0xfea   :  { %v1734_v31 = vmul.f32 %v2110_v44, %v1733_v52 }
 0xfeb   :  { %v1753_v54 = vsel %vm138_vm0, %v1749_v53, 0.0 }
 0xfec   :  { %1754 = vadd.xlane.f32.xlu0 %v1753_v54  ;;  %v1738_v55 = vsel %vm1737_vm6, %v2110_v44, %v1734_v31 }
 0xfed   :  { %v1740_v56 = vmul.f32 %v1738_v55, %v1706_v63 }
 0xfef   :  { %v1745_v57 = vmul.f32 %v2025_v43, %v1740_v56 }
 0xff1   :  { %v1750_v58 = vadd.f32 %v2026_v50, %v1745_v57 }
 0xff3   :  { %v1756_v59 = vsel %vm138_vm0, %v1750_v58, 0.0 }
 0xff4   :  { %1757 = vadd.xlane.f32.xlu1 %v1756_v59 }
0x105f   :  { %v1755_v60 = vpop.xlane.xlu0 %1754 }
0x1060   :  { %v1759_v61 = vmul.f32 %v1755_v60, %v2499_v42 }
0x1062   :  { %v1761_v62 = vsub.f32 %v1749_v53, %v1759_v61 }
0x1064   :  { %v1763_v4 = vmul.f32 %v1761_v62, %v1761_v62 }
0x1066   :  { %v1765_v5 = vsel %vm138_vm0, %v1763_v4, 0.0 }
0x1067   :  { %1766 = vadd.xlane.f32.xlu2 %v1765_v5  ;;  %v1758_v6 = vpop.xlane.xlu1 %1757 }
0x1068   :  { %v1760_v7 = vmul.f32 %v1758_v6, %v2499_v42 }
0x106a   :  { %v1762_v8 = vsub.f32 %v1750_v58, %v1760_v7 }
0x106c   :  { %v1764_v9 = vmul.f32 %v1762_v8, %v1762_v8 }
0x106e   :  { %v1768_v1 = vsel %vm138_vm0, %v1764_v9, 0.0 }
0x106f   :  { %1769 = vadd.xlane.f32.xlu0 %v1768_v1 }
0x10da   :  { %v1767_v10 = vpop.xlane.xlu2 %1766 }
0x10db   :  { %v1771_v11 = vmul.f32 %v1767_v10, %v2499_v42 }
0x10dd   :  { %v1773_v12 = vadd.f32 1e-05, %v1771_v11 }
0x10df   :  { %2111 = vrsqrt.f32 %v1773_v12  ;;  %vm1781_vm8 = vweird.f32 %v1773_v12 }
0x10e2   :  { %v1770_v14 = vpop.xlane.xlu0 %1769 }
0x10e3   :  { %v1772_v15 = vmul.f32 %v1770_v14, %v2499_v42 }
0x10e5   :  { %v2112_v35 = vpop.eup %2111  ;;  %v1774_v16 = vadd.f32 1e-05, %v1772_v15 }
0x10e6   :  { %v1776_v17 = vmul.f32 %v2112_v35, %v1773_v12  ;;  %vm1782_vm7 = vweird.f32 %v2112_v35 }
0x10e7   :  { %2113 = vrsqrt.f32 %v1774_v16  ;;  %vm1783_vm9 = vmor %vm1781_vm8, %vm1782_vm7  ;;  %vm1791_vm2 = vweird.f32 %v1774_v16 }
0x10e8   :  { %v1777_v18 = vmul.f32 %v2112_v35, %v1776_v17 }
0x10ea   :  { %v1778_v19 = vmul.f32 0.5, %v1777_v18 }
0x10ec   :  { %v1779_v34 = vsub.f32 1.5, %v1778_v19 }
0x10ed   :  { %v2114_v20 = vpop.eup %2113 }
0x10ee   :  { %v1780_v21 = vmul.f32 %v2112_v35, %v1779_v34  ;;  %v1786_v22 = vmul.f32 %v2114_v20, %v1774_v16  ;;  %vm1792_vm1 = vweird.f32 %v2114_v20 }
0x10ef   :  { %vm1793_vm3 = vmor %vm1791_vm2, %vm1792_vm1 }
0x10f0   :  { %v1784_v24 = vsel %vm1783_vm9, %v2112_v35, %v1780_v21  ;;  %v1787_v25 = vmul.f32 %v2114_v20, %v1786_v22 }
0x10f1   :  { %v1795_v42 = vmul.f32 %v1784_v24, %v1761_v62 }
0x10f2   :  { %v1788_v41 = vmul.f32 0.5, %v1787_v25 }
0x10f3   :  { %v1800_v33 = vmul.f32 %v2027_v23, %v1795_v42 }
0x10f4   :  { %v1789_v63 = vsub.f32 1.5, %v1788_v41 }
0x10f5   :  { %v1805_v26 = vadd.f32 %v2028_v2, %v1800_v33 }
0x10f6   :  { %v1790_v27 = vmul.f32 %v2114_v20, %v1789_v63 }
0x10f7   :  { %1807 = vst.msk [vmem:[#allocation11] sm:$0xff] %vm138_vm0, %v1805_v26 }
0x10f8   :  { %v1794_v3 = vsel %vm1793_vm3, %v2114_v20, %v1790_v27 }
0x10f9   :  { %v1796_v0 = vmul.f32 %v1794_v3, %v1762_v8 }
0x10fb   :  { %v1801_v28 = vmul.f32 %v2027_v23, %v1796_v0 }
0x10fd   :  { %v1806_v29 = vadd.f32 %v2028_v2, %v1801_v28 }
0x10ff   :  { %1808 = vst.msk [vmem:[#allocation11 + $0x8] sm:$0xff] %vm138_vm0, %v1806_v29 }
0x1100   :  { %1821 = dma.vmem_to_hbm [thread:$0]  %s1814_s26, 256, %s1816_s18, [#allocation5], %s2247_s30, %s2247_s30, %s2248_s2  }
0x1101   :  { %2241 = dma.done.wait [#allocation5], 256  }
0x1102   :  { %2242 = vsyncadd [#allocation5], 4294967040 }
0x1103   :  { %1826 = vsyncpa [#allocation4], 1 }
0x1104   :  { %1827 = vsyncpa [#allocation7], 1 }
0x1105   :  { %1828 = vsyncpa [#allocation10], 1 }
0x1106   :  { %1829 = vsyncpa [#allocation5], 1 }

</bundles_post_ra>
